<compile_context>
chip_gen: v5e
topology: v5e:2x2
jax: 0.10.0
libtpu: 0.0.40
codegen_flags: <defaults>
</compile_context>

<pallas_src>
import jax
import jax.numpy as jnp
from jax.experimental import pallas as pl
from jax.experimental.pallas import tpu as pltpu


def _leaky_relu(x, slope=0.2):
    return jnp.where(x > 0, x, slope * x)


def _sigmoid(x):
    return 1.0 / (1.0 + jnp.exp(-x))


def _softmax_last(x):
    m = jnp.max(x, axis=-1, keepdims=True)
    e = jnp.exp(x - m)
    return e / jnp.sum(e, axis=-1, keepdims=True)


def _make_kernel(B, T, lag, sample):
    """Build the Pallas kernel body (sample controls whether an eps ref is present)."""

    def kernel(*refs):
        if sample:
            (ft_ref, eps_ref, wih_ref, whh_ref, blstm_ref,
             w1_ref, b1_ref, w2_ref, b2_ref, w3_ref, b3_ref,
             latent_ref, mu_ref, sigma_ref) = refs
        else:
            (ft_ref, wih_ref, whh_ref, blstm_ref,
             w1_ref, b1_ref, w2_ref, b2_ref, w3_ref, b3_ref,
             latent_ref, mu_ref, sigma_ref) = refs
            eps_ref = None

        TB, Z = ft_ref.shape            # time-major flattened input (T*B, Z)
        G = 4 * Z                       # LSTM gate width
        F = b1_ref.shape[1]             # fused MLP hidden width (2*H)
        O = b3_ref.shape[1]             # fused MLP output width (2*Z)

        wih = wih_ref[...]
        whh = whh_ref[...]
        w1 = w1_ref[...]
        w2 = w2_ref[...]
        w3 = w3_ref[...]

        # Hoisted bias broadcasts (done once; NOT re-materialized per unrolled step).
        blstm_b = jnp.broadcast_to(blstm_ref[...], (TB, G))
        b1b = jnp.broadcast_to(b1_ref[...], (B, F))
        b2b = jnp.broadcast_to(b2_ref[...], (B, F))
        b3b = jnp.broadcast_to(b3_ref[...], (B, O))

        # ---- hoisted LSTM input projection: ONE (T*B,Z)@(Z,4Z) matmul for all steps ----
        ft2d = ft_ref[...]                                            # (T*B, Z)
        xg = jnp.dot(ft2d, wih, preferred_element_type=jnp.float32) + blstm_b

        eps2d = eps_ref[...] if sample else None                      # (T*B, Z)

        # ---- forward-direction LSTM recurrence (hidden = z_dim), gate order i,f,g,o ----
        h = jnp.zeros((B, Z), jnp.float32)
        c = jnp.zeros((B, Z), jnp.float32)
        betas = []
        for t in range(T):     # T small & static -> unrolled; 1 matmul/step on the MXU
            gates = xg[t * B:(t + 1) * B, :] + jnp.dot(
                h, whh, preferred_element_type=jnp.float32)
            # TODO(synk): gate extraction uses Z=8-lane slices; verify in a bundle dump
            # that this is not XLU-bound before pre-permuting weight columns host-side.
            i_g = _sigmoid(gates[:, 0 * Z:1 * Z])
            f_g = _sigmoid(gates[:, 1 * Z:2 * Z])
            g_g = jnp.tanh(gates[:, 2 * Z:3 * Z])
            o_g = _sigmoid(gates[:, 3 * Z:4 * Z])
            c = f_g * c + i_g * g_g
            h = o_g * jnp.tanh(c)
            betas.append(h)
        # TODO(synk): reverse direction of the bidirectional LSTM omitted — its half of
        # `beta` makes the concat width 6*z_dim, incompatible with the 3*z_dim
        # mu_sample/var_sample inputs in the reference, so it can never reach the outputs.

        # ---- per-step fused (mu | var) MLP + reparameterized sampling ----
        prev = [jnp.zeros((B, Z), jnp.float32)] * lag
        lat_pieces = [jnp.zeros((B, lag * Z), jnp.float32)]   # the `lag` zero init latents
        mu_pieces = []
        sig_pieces = []
        for t in range(T):
            # Two slots change every step (new latent AND new beta), so an incremental
            # roll+select state cannot beat this single 3-piece lane concat feeding the
            # fused W1 matmul.
            inp = jnp.concatenate(prev + [betas[t]], axis=1)          # (B, (lag+1)*Z)

            h1 = _leaky_relu(jnp.dot(inp, w1, preferred_element_type=jnp.float32) + b1b)
            h2 = _leaky_relu(jnp.dot(h1, w2, preferred_element_type=jnp.float32) + b2b)
            a3 = jnp.dot(h2, w3, preferred_element_type=jnp.float32) + b3b  # (B, 2Z)

            mut = _leaky_relu(a3[:, :Z])
            # TODO(synk): nn.Softmax(0.2) passes an invalid float dim in the reference;
            # softmax is applied over the feature axis here.
            sigmat = _softmax_last(a3[:, Z:])

            if sample:
                std = jnp.exp(sigmat * 0.5)                           # sigma.div(2).exp()
                latentt = mut + eps2d[t * B:(t + 1) * B, :] * std
            else:
                latentt = mut

            lat_pieces.append(latentt)
            mu_pieces.append(mut)
            sig_pieces.append(sigmat)
            prev = prev[1:] + [latentt]

        # ---- single lane-dense store per output (no per-step 8-lane masked stores) ----
        latent_ref[...] = jnp.concatenate(lat_pieces, axis=1)         # (B, (lag+T)*Z)
        mu_ref[...] = jnp.concatenate(mu_pieces, axis=1)              # (B, T*Z)
        sigma_ref[...] = jnp.concatenate(sig_pieces, axis=1)          # (B, T*Z)

    return kernel


def _fuse_mlp_params(params):
    """Host-side fusion of mu_sample / var_sample into one block-diagonal MLP."""
    wm1, wv1 = params["wm1"], params["wv1"]
    wm2, wv2 = params["wm2"], params["wv2"]
    wm3, wv3 = params["wm3"], params["wv3"]
    H = wm2.shape[0]
    Z = wm3.shape[1]
    zHH = jnp.zeros((H, H), jnp.float32)
    zHZ = jnp.zeros((H, Z), jnp.float32)

    w1 = jnp.concatenate([wm1, wv1], axis=1)                              # (3Z, 2H)
    b1 = jnp.concatenate([params["bm1"], params["bv1"]], axis=1)          # (1, 2H)
    w2 = jnp.concatenate(
        [jnp.concatenate([wm2, zHH], axis=1),
         jnp.concatenate([zHH, wv2], axis=1)], axis=0)                    # (2H, 2H)
    b2 = jnp.concatenate([params["bm2"], params["bv2"]], axis=1)          # (1, 2H)
    w3 = jnp.concatenate(
        [jnp.concatenate([wm3, zHZ], axis=1),
         jnp.concatenate([zHZ, wv3], axis=1)], axis=0)                    # (2H, 2Z)
    b3 = jnp.concatenate([params["bm3"], params["bv3"]], axis=1)          # (1, 2Z)
    return w1, b1, w2, b2, w3, b3


def init_params(key, z_dim=8, hidden_dim=32):
    Z, H = z_dim, hidden_dim
    keys = jax.random.split(key, 9)

    def w(k, shape, scale=0.1):
        return scale * jax.random.normal(k, shape, jnp.float32)

    return {
        # LSTM (forward direction); bias_ih + bias_hh folded into one bias
        "wih": w(keys[0], (Z, 4 * Z)),
        "whh": w(keys[1], (Z, 4 * Z)),
        "blstm": w(keys[2], (1, 4 * Z), 0.01),
        # mu_sample MLP: 3Z -> H -> H -> Z
        "wm1": w(keys[3], (3 * Z, H)),
        "bm1": jnp.zeros((1, H), jnp.float32),
        "wm2": w(keys[4], (H, H)),
        "bm2": jnp.zeros((1, H), jnp.float32),
        "wm3": w(keys[5], (H, Z)),
        "bm3": jnp.zeros((1, Z), jnp.float32),
        # var_sample MLP: 3Z -> H -> H -> Z
        "wv1": w(keys[6], (3 * Z, H)),
        "bv1": jnp.zeros((1, H), jnp.float32),
        "wv2": w(keys[7], (H, H)),
        "bv2": jnp.zeros((1, H), jnp.float32),
        "wv3": w(keys[8], (H, Z)),
        "bv3": jnp.zeros((1, Z), jnp.float32),
    }


def inference_net_forward(ft, eps, params, lag=2, sample=True):
    B, T, Z = ft.shape
    w1, b1, w2, b2, w3, b3 = _fuse_mlp_params(params)

    # Time-major 2-D layout so the LSTM input projection is one batched matmul and all
    # per-step in-kernel slices are cheap static sublane slices.
    ft_tm = jnp.transpose(ft, (1, 0, 2)).reshape(T * B, Z)

    args = [ft_tm]
    if sample:
        eps_tm = jnp.transpose(eps, (1, 0, 2)).reshape(T * B, Z)
        args.append(eps_tm)
    args += [params["wih"], params["whh"], params["blstm"], w1, b1, w2, b2, w3, b3]

    vmem = pl.BlockSpec(memory_space=pltpu.MemorySpace.VMEM)
    latent2d, mu2d, sigma2d = pl.pallas_call(
        _make_kernel(B, T, lag, sample),
        out_shape=(
            jax.ShapeDtypeStruct((B, (lag + T) * Z), jnp.float32),
            jax.ShapeDtypeStruct((B, T * Z), jnp.float32),
            jax.ShapeDtypeStruct((B, T * Z), jnp.float32),
        ),
        in_specs=[vmem] * len(args),
        out_specs=(vmem, vmem, vmem),
    )(*args)

    latent = latent2d.reshape(B, lag + T, Z)
    mu = mu2d.reshape(B, T, Z)
    sigma = sigma2d.reshape(B, T, Z)
    # torch.squeeze(torch.stack(...)) — no-op here unless some dim is 1
    return jnp.squeeze(latent), jnp.squeeze(mu), jnp.squeeze(sigma)


if __name__ == "__main__":
    B, T, Z, H, LAG = 2, 8, 8, 32, 2
    key = jax.random.PRNGKey(0)
    k_ft, k_eps, k_par = jax.random.split(key, 3)

    ft = jax.random.normal(k_ft, (B, T, Z), jnp.float32)
    eps = jax.random.normal(k_eps, (B, T, Z), jnp.float32)   # reparam noise (deterministic)
    params = init_params(k_par, z_dim=Z, hidden_dim=H)

    latent, mu, sigma = inference_net_forward(ft, eps, params, lag=LAG, sample=True)
    jax.block_until_ready((latent, mu, sigma))

    assert latent.shape == (B, LAG + T, Z)
    assert mu.shape == (B, T, Z)
    assert sigma.shape == (B, T, Z)
    print("KERNEL_OK")
</pallas_src>

<mosaic_0001>
module attributes {stable_mosaic.version = 11 : i64} {
  func.func @kernel(%arg0: memref<16x8xf32, #tpu.memory_space<vmem>>, %arg1: memref<16x8xf32, #tpu.memory_space<vmem>>, %arg2: memref<8x32xf32, #tpu.memory_space<vmem>>, %arg3: memref<8x32xf32, #tpu.memory_space<vmem>>, %arg4: memref<1x32xf32, #tpu.memory_space<vmem>>, %arg5: memref<24x64xf32, #tpu.memory_space<vmem>>, %arg6: memref<1x64xf32, #tpu.memory_space<vmem>>, %arg7: memref<64x64xf32, #tpu.memory_space<vmem>>, %arg8: memref<1x64xf32, #tpu.memory_space<vmem>>, %arg9: memref<64x16xf32, #tpu.memory_space<vmem>>, %arg10: memref<1x16xf32, #tpu.memory_space<vmem>>, %arg11: memref<2x80xf32, #tpu.memory_space<vmem>>, %arg12: memref<2x64xf32, #tpu.memory_space<vmem>>, %arg13: memref<2x64xf32, #tpu.memory_space<vmem>>) attributes {dimension_semantics = [], scalar_prefetch = 0 : i64, scratch_operands = 0 : i64, tpu.core_type = #tpu.core_type<tc>} {
    %c0 = arith.constant 0 : index
    %c0_0 = arith.constant 0 : index
    %0 = vector.load %arg2[%c0, %c0_0] : memref<8x32xf32, #tpu.memory_space<vmem>>, vector<8x32xf32>
    %c0_1 = arith.constant 0 : index
    %c0_2 = arith.constant 0 : index
    %1 = vector.load %arg3[%c0_1, %c0_2] : memref<8x32xf32, #tpu.memory_space<vmem>>, vector<8x32xf32>
    %c0_3 = arith.constant 0 : index
    %c0_4 = arith.constant 0 : index
    %2 = vector.load %arg5[%c0_3, %c0_4] : memref<24x64xf32, #tpu.memory_space<vmem>>, vector<24x64xf32>
    %c0_5 = arith.constant 0 : index
    %c0_6 = arith.constant 0 : index
    %3 = vector.load %arg7[%c0_5, %c0_6] : memref<64x64xf32, #tpu.memory_space<vmem>>, vector<64x64xf32>
    %c0_7 = arith.constant 0 : index
    %c0_8 = arith.constant 0 : index
    %4 = vector.load %arg9[%c0_7, %c0_8] : memref<64x16xf32, #tpu.memory_space<vmem>>, vector<64x16xf32>
    %c0_9 = arith.constant 0 : index
    %c0_10 = arith.constant 0 : index
    %5 = vector.load %arg4[%c0_9, %c0_10] : memref<1x32xf32, #tpu.memory_space<vmem>>, vector<1x32xf32>
    %6 = vector.shape_cast %5 : vector<1x32xf32> to vector<1x32xf32>
    %7 = vector.broadcast %6 : vector<1x32xf32> to vector<16x32xf32>
    %c0_11 = arith.constant 0 : index
    %c0_12 = arith.constant 0 : index
    %8 = vector.load %arg6[%c0_11, %c0_12] : memref<1x64xf32, #tpu.memory_space<vmem>>, vector<1x64xf32>
    %9 = vector.shape_cast %8 : vector<1x64xf32> to vector<1x64xf32>
    %10 = vector.broadcast %9 : vector<1x64xf32> to vector<2x64xf32>
    %c0_13 = arith.constant 0 : index
    %c0_14 = arith.constant 0 : index
    %11 = vector.load %arg8[%c0_13, %c0_14] : memref<1x64xf32, #tpu.memory_space<vmem>>, vector<1x64xf32>
    %12 = vector.shape_cast %11 : vector<1x64xf32> to vector<1x64xf32>
    %13 = vector.broadcast %12 : vector<1x64xf32> to vector<2x64xf32>
    %c0_15 = arith.constant 0 : index
    %c0_16 = arith.constant 0 : index
    %14 = vector.load %arg10[%c0_15, %c0_16] : memref<1x16xf32, #tpu.memory_space<vmem>>, vector<1x16xf32>
    %15 = vector.shape_cast %14 : vector<1x16xf32> to vector<1x16xf32>
    %16 = vector.broadcast %15 : vector<1x16xf32> to vector<2x16xf32>
    %c0_17 = arith.constant 0 : index
    %c0_18 = arith.constant 0 : index
    %17 = vector.load %arg0[%c0_17, %c0_18] : memref<16x8xf32, #tpu.memory_space<vmem>>, vector<16x8xf32>
    %cst = arith.constant dense<0.000000e+00> : vector<16x32xf32>
    %18 = tpu.matmul %17, %0, %cst {dimension_numbers = #tpu.dot_dimension_numbers<[1], [0], [0], [1], [0, 0, 1, 1], [], []>} : vector<16x8xf32>, vector<8x32xf32>, vector<16x32xf32> -> vector<16x32xf32>
    %19 = arith.addf %18, %7 : vector<16x32xf32>
    %c0_19 = arith.constant 0 : index
    %c0_20 = arith.constant 0 : index
    %20 = vector.load %arg1[%c0_19, %c0_20] : memref<16x8xf32, #tpu.memory_space<vmem>>, vector<16x8xf32>
    %cst_21 = arith.constant 0.000000e+00 : f32
    %21 = vector.broadcast %cst_21 : f32 to vector<2x8xf32>
    %cst_22 = arith.constant 0.000000e+00 : f32
    %22 = vector.broadcast %cst_22 : f32 to vector<2x8xf32>
    %23 = vector.extract_strided_slice %19 {offsets = [0, 0], sizes = [2, 32], strides = [1, 1]} : vector<16x32xf32> to vector<2x32xf32>
    %cst_23 = arith.constant dense<0.000000e+00> : vector<2x32xf32>
    %24 = tpu.matmul %21, %1, %cst_23 {dimension_numbers = #tpu.dot_dimension_numbers<[1], [0], [0], [1], [0, 0, 1, 1], [], []>} : vector<2x8xf32>, vector<8x32xf32>, vector<2x32xf32> -> vector<2x32xf32>
    %25 = arith.addf %23, %24 : vector<2x32xf32>
    %26 = vector.extract_strided_slice %25 {offsets = [0, 0], sizes = [2, 8], strides = [1, 1]} : vector<2x32xf32> to vector<2x8xf32>
    %cst_24 = arith.constant 0.000000e+00 : f32
    %27 = vector.broadcast %cst_24 : f32 to vector<2x8xf32>
    %28 = arith.subf %27, %26 : vector<2x8xf32>
    %29 = math.exp %28 : vector<2x8xf32>
    %cst_25 = arith.constant 1.000000e+00 : f32
    %30 = vector.broadcast %cst_25 : f32 to vector<2x8xf32>
    %31 = arith.addf %30, %29 : vector<2x8xf32>
    %cst_26 = arith.constant 1.000000e+00 : f32
    %32 = vector.broadcast %cst_26 : f32 to vector<2x8xf32>
    %33 = arith.divf %32, %31 : vector<2x8xf32>
    %34 = vector.extract_strided_slice %25 {offsets = [0, 8], sizes = [2, 8], strides = [1, 1]} : vector<2x32xf32> to vector<2x8xf32>
    %cst_27 = arith.constant 0.000000e+00 : f32
    %35 = vector.broadcast %cst_27 : f32 to vector<2x8xf32>
    %36 = arith.subf %35, %34 : vector<2x8xf32>
    %37 = math.exp %36 : vector<2x8xf32>
    %cst_28 = arith.constant 1.000000e+00 : f32
    %38 = vector.broadcast %cst_28 : f32 to vector<2x8xf32>
    %39 = arith.addf %38, %37 : vector<2x8xf32>
    %cst_29 = arith.constant 1.000000e+00 : f32
    %40 = vector.broadcast %cst_29 : f32 to vector<2x8xf32>
    %41 = arith.divf %40, %39 : vector<2x8xf32>
    %42 = vector.extract_strided_slice %25 {offsets = [0, 16], sizes = [2, 8], strides = [1, 1]} : vector<2x32xf32> to vector<2x8xf32>
    %43 = math.tanh %42 : vector<2x8xf32>
    %44 = vector.extract_strided_slice %25 {offsets = [0, 24], sizes = [2, 8], strides = [1, 1]} : vector<2x32xf32> to vector<2x8xf32>
    %cst_30 = arith.constant 0.000000e+00 : f32
    %45 = vector.broadcast %cst_30 : f32 to vector<2x8xf32>
    %46 = arith.subf %45, %44 : vector<2x8xf32>
    %47 = math.exp %46 : vector<2x8xf32>
    %cst_31 = arith.constant 1.000000e+00 : f32
    %48 = vector.broadcast %cst_31 : f32 to vector<2x8xf32>
    %49 = arith.addf %48, %47 : vector<2x8xf32>
    %cst_32 = arith.constant 1.000000e+00 : f32
    %50 = vector.broadcast %cst_32 : f32 to vector<2x8xf32>
    %51 = arith.divf %50, %49 : vector<2x8xf32>
    %52 = arith.mulf %41, %22 : vector<2x8xf32>
    %53 = arith.mulf %33, %43 : vector<2x8xf32>
    %54 = arith.addf %52, %53 : vector<2x8xf32>
    %55 = math.tanh %54 : vector<2x8xf32>
    %56 = arith.mulf %51, %55 : vector<2x8xf32>
    %57 = vector.extract_strided_slice %19 {offsets = [2, 0], sizes = [2, 32], strides = [1, 1]} : vector<16x32xf32> to vector<2x32xf32>
    %cst_33 = arith.constant dense<0.000000e+00> : vector<2x32xf32>
    %58 = tpu.matmul %56, %1, %cst_33 {dimension_numbers = #tpu.dot_dimension_numbers<[1], [0], [0], [1], [0, 0, 1, 1], [], []>} : vector<2x8xf32>, vector<8x32xf32>, vector<2x32xf32> -> vector<2x32xf32>
    %59 = arith.addf %57, %58 : vector<2x32xf32>
    %60 = vector.extract_strided_slice %59 {offsets = [0, 0], sizes = [2, 8], strides = [1, 1]} : vector<2x32xf32> to vector<2x8xf32>
    %cst_34 = arith.constant 0.000000e+00 : f32
    %61 = vector.broadcast %cst_34 : f32 to vector<2x8xf32>
    %62 = arith.subf %61, %60 : vector<2x8xf32>
    %63 = math.exp %62 : vector<2x8xf32>
    %cst_35 = arith.constant 1.000000e+00 : f32
    %64 = vector.broadcast %cst_35 : f32 to vector<2x8xf32>
    %65 = arith.addf %64, %63 : vector<2x8xf32>
    %cst_36 = arith.constant 1.000000e+00 : f32
    %66 = vector.broadcast %cst_36 : f32 to vector<2x8xf32>
    %67 = arith.divf %66, %65 : vector<2x8xf32>
    %68 = vector.extract_strided_slice %59 {offsets = [0, 8], sizes = [2, 8], strides = [1, 1]} : vector<2x32xf32> to vector<2x8xf32>
    %cst_37 = arith.constant 0.000000e+00 : f32
    %69 = vector.broadcast %cst_37 : f32 to vector<2x8xf32>
    %70 = arith.subf %69, %68 : vector<2x8xf32>
    %71 = math.exp %70 : vector<2x8xf32>
    %cst_38 = arith.constant 1.000000e+00 : f32
    %72 = vector.broadcast %cst_38 : f32 to vector<2x8xf32>
    %73 = arith.addf %72, %71 : vector<2x8xf32>
    %cst_39 = arith.constant 1.000000e+00 : f32
    %74 = vector.broadcast %cst_39 : f32 to vector<2x8xf32>
    %75 = arith.divf %74, %73 : vector<2x8xf32>
    %76 = vector.extract_strided_slice %59 {offsets = [0, 16], sizes = [2, 8], strides = [1, 1]} : vector<2x32xf32> to vector<2x8xf32>
    %77 = math.tanh %76 : vector<2x8xf32>
    %78 = vector.extract_strided_slice %59 {offsets = [0, 24], sizes = [2, 8], strides = [1, 1]} : vector<2x32xf32> to vector<2x8xf32>
    %cst_40 = arith.constant 0.000000e+00 : f32
    %79 = vector.broadcast %cst_40 : f32 to vector<2x8xf32>
    %80 = arith.subf %79, %78 : vector<2x8xf32>
    %81 = math.exp %80 : vector<2x8xf32>
    %cst_41 = arith.constant 1.000000e+00 : f32
    %82 = vector.broadcast %cst_41 : f32 to vector<2x8xf32>
    %83 = arith.addf %82, %81 : vector<2x8xf32>
    %cst_42 = arith.constant 1.000000e+00 : f32
    %84 = vector.broadcast %cst_42 : f32 to vector<2x8xf32>
    %85 = arith.divf %84, %83 : vector<2x8xf32>
    %86 = arith.mulf %75, %54 : vector<2x8xf32>
    %87 = arith.mulf %67, %77 : vector<2x8xf32>
    %88 = arith.addf %86, %87 : vector<2x8xf32>
    %89 = math.tanh %88 : vector<2x8xf32>
    %90 = arith.mulf %85, %89 : vector<2x8xf32>
    %91 = vector.extract_strided_slice %19 {offsets = [4, 0], sizes = [2, 32], strides = [1, 1]} : vector<16x32xf32> to vector<2x32xf32>
    %cst_43 = arith.constant dense<0.000000e+00> : vector<2x32xf32>
    %92 = tpu.matmul %90, %1, %cst_43 {dimension_numbers = #tpu.dot_dimension_numbers<[1], [0], [0], [1], [0, 0, 1, 1], [], []>} : vector<2x8xf32>, vector<8x32xf32>, vector<2x32xf32> -> vector<2x32xf32>
    %93 = arith.addf %91, %92 : vector<2x32xf32>
    %94 = vector.extract_strided_slice %93 {offsets = [0, 0], sizes = [2, 8], strides = [1, 1]} : vector<2x32xf32> to vector<2x8xf32>
    %cst_44 = arith.constant 0.000000e+00 : f32
    %95 = vector.broadcast %cst_44 : f32 to vector<2x8xf32>
    %96 = arith.subf %95, %94 : vector<2x8xf32>
    %97 = math.exp %96 : vector<2x8xf32>
    %cst_45 = arith.constant 1.000000e+00 : f32
    %98 = vector.broadcast %cst_45 : f32 to vector<2x8xf32>
    %99 = arith.addf %98, %97 : vector<2x8xf32>
    %cst_46 = arith.constant 1.000000e+00 : f32
    %100 = vector.broadcast %cst_46 : f32 to vector<2x8xf32>
    %101 = arith.divf %100, %99 : vector<2x8xf32>
    %102 = vector.extract_strided_slice %93 {offsets = [0, 8], sizes = [2, 8], strides = [1, 1]} : vector<2x32xf32> to vector<2x8xf32>
    %cst_47 = arith.constant 0.000000e+00 : f32
    %103 = vector.broadcast %cst_47 : f32 to vector<2x8xf32>
    %104 = arith.subf %103, %102 : vector<2x8xf32>
    %105 = math.exp %104 : vector<2x8xf32>
    %cst_48 = arith.constant 1.000000e+00 : f32
    %106 = vector.broadcast %cst_48 : f32 to vector<2x8xf32>
    %107 = arith.addf %106, %105 : vector<2x8xf32>
    %cst_49 = arith.constant 1.000000e+00 : f32
    %108 = vector.broadcast %cst_49 : f32 to vector<2x8xf32>
    %109 = arith.divf %108, %107 : vector<2x8xf32>
    %110 = vector.extract_strided_slice %93 {offsets = [0, 16], sizes = [2, 8], strides = [1, 1]} : vector<2x32xf32> to vector<2x8xf32>
    %111 = math.tanh %110 : vector<2x8xf32>
    %112 = vector.extract_strided_slice %93 {offsets = [0, 24], sizes = [2, 8], strides = [1, 1]} : vector<2x32xf32> to vector<2x8xf32>
    %cst_50 = arith.constant 0.000000e+00 : f32
    %113 = vector.broadcast %cst_50 : f32 to vector<2x8xf32>
    %114 = arith.subf %113, %112 : vector<2x8xf32>
    %115 = math.exp %114 : vector<2x8xf32>
    %cst_51 = arith.constant 1.000000e+00 : f32
    %116 = vector.broadcast %cst_51 : f32 to vector<2x8xf32>
    %117 = arith.addf %116, %115 : vector<2x8xf32>
    %cst_52 = arith.constant 1.000000e+00 : f32
    %118 = vector.broadcast %cst_52 : f32 to vector<2x8xf32>
    %119 = arith.divf %118, %117 : vector<2x8xf32>
    %120 = arith.mulf %109, %88 : vector<2x8xf32>
    %121 = arith.mulf %101, %111 : vector<2x8xf32>
    %122 = arith.addf %120, %121 : vector<2x8xf32>
    %123 = math.tanh %122 : vector<2x8xf32>
    %124 = arith.mulf %119, %123 : vector<2x8xf32>
    %125 = vector.extract_strided_slice %19 {offsets = [6, 0], sizes = [2, 32], strides = [1, 1]} : vector<16x32xf32> to vector<2x32xf32>
    %cst_53 = arith.constant dense<0.000000e+00> : vector<2x32xf32>
    %126 = tpu.matmul %124, %1, %cst_53 {dimension_numbers = #tpu.dot_dimension_numbers<[1], [0], [0], [1], [0, 0, 1, 1], [], []>} : vector<2x8xf32>, vector<8x32xf32>, vector<2x32xf32> -> vector<2x32xf32>
    %127 = arith.addf %125, %126 : vector<2x32xf32>
    %128 = vector.extract_strided_slice %127 {offsets = [0, 0], sizes = [2, 8], strides = [1, 1]} : vector<2x32xf32> to vector<2x8xf32>
    %cst_54 = arith.constant 0.000000e+00 : f32
    %129 = vector.broadcast %cst_54 : f32 to vector<2x8xf32>
    %130 = arith.subf %129, %128 : vector<2x8xf32>
    %131 = math.exp %130 : vector<2x8xf32>
    %cst_55 = arith.constant 1.000000e+00 : f32
    %132 = vector.broadcast %cst_55 : f32 to vector<2x8xf32>
    %133 = arith.addf %132, %131 : vector<2x8xf32>
    %cst_56 = arith.constant 1.000000e+00 : f32
    %134 = vector.broadcast %cst_56 : f32 to vector<2x8xf32>
    %135 = arith.divf %134, %133 : vector<2x8xf32>
    %136 = vector.extract_strided_slice %127 {offsets = [0, 8], sizes = [2, 8], strides = [1, 1]} : vector<2x32xf32> to vector<2x8xf32>
    %cst_57 = arith.constant 0.000000e+00 : f32
    %137 = vector.broadcast %cst_57 : f32 to vector<2x8xf32>
    %138 = arith.subf %137, %136 : vector<2x8xf32>
    %139 = math.exp %138 : vector<2x8xf32>
    %cst_58 = arith.constant 1.000000e+00 : f32
    %140 = vector.broadcast %cst_58 : f32 to vector<2x8xf32>
    %141 = arith.addf %140, %139 : vector<2x8xf32>
    %cst_59 = arith.constant 1.000000e+00 : f32
    %142 = vector.broadcast %cst_59 : f32 to vector<2x8xf32>
    %143 = arith.divf %142, %141 : vector<2x8xf32>
    %144 = vector.extract_strided_slice %127 {offsets = [0, 16], sizes = [2, 8], strides = [1, 1]} : vector<2x32xf32> to vector<2x8xf32>
    %145 = math.tanh %144 : vector<2x8xf32>
    %146 = vector.extract_strided_slice %127 {offsets = [0, 24], sizes = [2, 8], strides = [1, 1]} : vector<2x32xf32> to vector<2x8xf32>
    %cst_60 = arith.constant 0.000000e+00 : f32
    %147 = vector.broadcast %cst_60 : f32 to vector<2x8xf32>
    %148 = arith.subf %147, %146 : vector<2x8xf32>
    %149 = math.exp %148 : vector<2x8xf32>
    %cst_61 = arith.constant 1.000000e+00 : f32
    %150 = vector.broadcast %cst_61 : f32 to vector<2x8xf32>
    %151 = arith.addf %150, %149 : vector<2x8xf32>
    %cst_62 = arith.constant 1.000000e+00 : f32
    %152 = vector.broadcast %cst_62 : f32 to vector<2x8xf32>
    %153 = arith.divf %152, %151 : vector<2x8xf32>
    %154 = arith.mulf %143, %122 : vector<2x8xf32>
    %155 = arith.mulf %135, %145 : vector<2x8xf32>
    %156 = arith.addf %154, %155 : vector<2x8xf32>
    %157 = math.tanh %156 : vector<2x8xf32>
    %158 = arith.mulf %153, %157 : vector<2x8xf32>
    %159 = vector.extract_strided_slice %19 {offsets = [8, 0], sizes = [2, 32], strides = [1, 1]} : vector<16x32xf32> to vector<2x32xf32>
    %cst_63 = arith.constant dense<0.000000e+00> : vector<2x32xf32>
    %160 = tpu.matmul %158, %1, %cst_63 {dimension_numbers = #tpu.dot_dimension_numbers<[1], [0], [0], [1], [0, 0, 1, 1], [], []>} : vector<2x8xf32>, vector<8x32xf32>, vector<2x32xf32> -> vector<2x32xf32>
    %161 = arith.addf %159, %160 : vector<2x32xf32>
    %162 = vector.extract_strided_slice %161 {offsets = [0, 0], sizes = [2, 8], strides = [1, 1]} : vector<2x32xf32> to vector<2x8xf32>
    %cst_64 = arith.constant 0.000000e+00 : f32
    %163 = vector.broadcast %cst_64 : f32 to vector<2x8xf32>
    %164 = arith.subf %163, %162 : vector<2x8xf32>
    %165 = math.exp %164 : vector<2x8xf32>
    %cst_65 = arith.constant 1.000000e+00 : f32
    %166 = vector.broadcast %cst_65 : f32 to vector<2x8xf32>
    %167 = arith.addf %166, %165 : vector<2x8xf32>
    %cst_66 = arith.constant 1.000000e+00 : f32
    %168 = vector.broadcast %cst_66 : f32 to vector<2x8xf32>
    %169 = arith.divf %168, %167 : vector<2x8xf32>
    %170 = vector.extract_strided_slice %161 {offsets = [0, 8], sizes = [2, 8], strides = [1, 1]} : vector<2x32xf32> to vector<2x8xf32>
    %cst_67 = arith.constant 0.000000e+00 : f32
    %171 = vector.broadcast %cst_67 : f32 to vector<2x8xf32>
    %172 = arith.subf %171, %170 : vector<2x8xf32>
    %173 = math.exp %172 : vector<2x8xf32>
    %cst_68 = arith.constant 1.000000e+00 : f32
    %174 = vector.broadcast %cst_68 : f32 to vector<2x8xf32>
    %175 = arith.addf %174, %173 : vector<2x8xf32>
    %cst_69 = arith.constant 1.000000e+00 : f32
    %176 = vector.broadcast %cst_69 : f32 to vector<2x8xf32>
    %177 = arith.divf %176, %175 : vector<2x8xf32>
    %178 = vector.extract_strided_slice %161 {offsets = [0, 16], sizes = [2, 8], strides = [1, 1]} : vector<2x32xf32> to vector<2x8xf32>
    %179 = math.tanh %178 : vector<2x8xf32>
    %180 = vector.extract_strided_slice %161 {offsets = [0, 24], sizes = [2, 8], strides = [1, 1]} : vector<2x32xf32> to vector<2x8xf32>
    %cst_70 = arith.constant 0.000000e+00 : f32
    %181 = vector.broadcast %cst_70 : f32 to vector<2x8xf32>
    %182 = arith.subf %181, %180 : vector<2x8xf32>
    %183 = math.exp %182 : vector<2x8xf32>
    %cst_71 = arith.constant 1.000000e+00 : f32
    %184 = vector.broadcast %cst_71 : f32 to vector<2x8xf32>
    %185 = arith.addf %184, %183 : vector<2x8xf32>
    %cst_72 = arith.constant 1.000000e+00 : f32
    %186 = vector.broadcast %cst_72 : f32 to vector<2x8xf32>
    %187 = arith.divf %186, %185 : vector<2x8xf32>
    %188 = arith.mulf %177, %156 : vector<2x8xf32>
    %189 = arith.mulf %169, %179 : vector<2x8xf32>
    %190 = arith.addf %188, %189 : vector<2x8xf32>
    %191 = math.tanh %190 : vector<2x8xf32>
    %192 = arith.mulf %187, %191 : vector<2x8xf32>
    %193 = vector.extract_strided_slice %19 {offsets = [10, 0], sizes = [2, 32], strides = [1, 1]} : vector<16x32xf32> to vector<2x32xf32>
    %cst_73 = arith.constant dense<0.000000e+00> : vector<2x32xf32>
    %194 = tpu.matmul %192, %1, %cst_73 {dimension_numbers = #tpu.dot_dimension_numbers<[1], [0], [0], [1], [0, 0, 1, 1], [], []>} : vector<2x8xf32>, vector<8x32xf32>, vector<2x32xf32> -> vector<2x32xf32>
    %195 = arith.addf %193, %194 : vector<2x32xf32>
    %196 = vector.extract_strided_slice %195 {offsets = [0, 0], sizes = [2, 8], strides = [1, 1]} : vector<2x32xf32> to vector<2x8xf32>
    %cst_74 = arith.constant 0.000000e+00 : f32
    %197 = vector.broadcast %cst_74 : f32 to vector<2x8xf32>
    %198 = arith.subf %197, %196 : vector<2x8xf32>
    %199 = math.exp %198 : vector<2x8xf32>
    %cst_75 = arith.constant 1.000000e+00 : f32
    %200 = vector.broadcast %cst_75 : f32 to vector<2x8xf32>
    %201 = arith.addf %200, %199 : vector<2x8xf32>
    %cst_76 = arith.constant 1.000000e+00 : f32
    %202 = vector.broadcast %cst_76 : f32 to vector<2x8xf32>
    %203 = arith.divf %202, %201 : vector<2x8xf32>
    %204 = vector.extract_strided_slice %195 {offsets = [0, 8], sizes = [2, 8], strides = [1, 1]} : vector<2x32xf32> to vector<2x8xf32>
    %cst_77 = arith.constant 0.000000e+00 : f32
    %205 = vector.broadcast %cst_77 : f32 to vector<2x8xf32>
    %206 = arith.subf %205, %204 : vector<2x8xf32>
    %207 = math.exp %206 : vector<2x8xf32>
    %cst_78 = arith.constant 1.000000e+00 : f32
    %208 = vector.broadcast %cst_78 : f32 to vector<2x8xf32>
    %209 = arith.addf %208, %207 : vector<2x8xf32>
    %cst_79 = arith.constant 1.000000e+00 : f32
    %210 = vector.broadcast %cst_79 : f32 to vector<2x8xf32>
    %211 = arith.divf %210, %209 : vector<2x8xf32>
    %212 = vector.extract_strided_slice %195 {offsets = [0, 16], sizes = [2, 8], strides = [1, 1]} : vector<2x32xf32> to vector<2x8xf32>
    %213 = math.tanh %212 : vector<2x8xf32>
    %214 = vector.extract_strided_slice %195 {offsets = [0, 24], sizes = [2, 8], strides = [1, 1]} : vector<2x32xf32> to vector<2x8xf32>
    %cst_80 = arith.constant 0.000000e+00 : f32
    %215 = vector.broadcast %cst_80 : f32 to vector<2x8xf32>
    %216 = arith.subf %215, %214 : vector<2x8xf32>
    %217 = math.exp %216 : vector<2x8xf32>
    %cst_81 = arith.constant 1.000000e+00 : f32
    %218 = vector.broadcast %cst_81 : f32 to vector<2x8xf32>
    %219 = arith.addf %218, %217 : vector<2x8xf32>
    %cst_82 = arith.constant 1.000000e+00 : f32
    %220 = vector.broadcast %cst_82 : f32 to vector<2x8xf32>
    %221 = arith.divf %220, %219 : vector<2x8xf32>
    %222 = arith.mulf %211, %190 : vector<2x8xf32>
    %223 = arith.mulf %203, %213 : vector<2x8xf32>
    %224 = arith.addf %222, %223 : vector<2x8xf32>
    %225 = math.tanh %224 : vector<2x8xf32>
    %226 = arith.mulf %221, %225 : vector<2x8xf32>
    %227 = vector.extract_strided_slice %19 {offsets = [12, 0], sizes = [2, 32], strides = [1, 1]} : vector<16x32xf32> to vector<2x32xf32>
    %cst_83 = arith.constant dense<0.000000e+00> : vector<2x32xf32>
    %228 = tpu.matmul %226, %1, %cst_83 {dimension_numbers = #tpu.dot_dimension_numbers<[1], [0], [0], [1], [0, 0, 1, 1], [], []>} : vector<2x8xf32>, vector<8x32xf32>, vector<2x32xf32> -> vector<2x32xf32>
    %229 = arith.addf %227, %228 : vector<2x32xf32>
    %230 = vector.extract_strided_slice %229 {offsets = [0, 0], sizes = [2, 8], strides = [1, 1]} : vector<2x32xf32> to vector<2x8xf32>
    %cst_84 = arith.constant 0.000000e+00 : f32
    %231 = vector.broadcast %cst_84 : f32 to vector<2x8xf32>
    %232 = arith.subf %231, %230 : vector<2x8xf32>
    %233 = math.exp %232 : vector<2x8xf32>
    %cst_85 = arith.constant 1.000000e+00 : f32
    %234 = vector.broadcast %cst_85 : f32 to vector<2x8xf32>
    %235 = arith.addf %234, %233 : vector<2x8xf32>
    %cst_86 = arith.constant 1.000000e+00 : f32
    %236 = vector.broadcast %cst_86 : f32 to vector<2x8xf32>
    %237 = arith.divf %236, %235 : vector<2x8xf32>
    %238 = vector.extract_strided_slice %229 {offsets = [0, 8], sizes = [2, 8], strides = [1, 1]} : vector<2x32xf32> to vector<2x8xf32>
    %cst_87 = arith.constant 0.000000e+00 : f32
    %239 = vector.broadcast %cst_87 : f32 to vector<2x8xf32>
    %240 = arith.subf %239, %238 : vector<2x8xf32>
    %241 = math.exp %240 : vector<2x8xf32>
    %cst_88 = arith.constant 1.000000e+00 : f32
    %242 = vector.broadcast %cst_88 : f32 to vector<2x8xf32>
    %243 = arith.addf %242, %241 : vector<2x8xf32>
    %cst_89 = arith.constant 1.000000e+00 : f32
    %244 = vector.broadcast %cst_89 : f32 to vector<2x8xf32>
    %245 = arith.divf %244, %243 : vector<2x8xf32>
    %246 = vector.extract_strided_slice %229 {offsets = [0, 16], sizes = [2, 8], strides = [1, 1]} : vector<2x32xf32> to vector<2x8xf32>
    %247 = math.tanh %246 : vector<2x8xf32>
    %248 = vector.extract_strided_slice %229 {offsets = [0, 24], sizes = [2, 8], strides = [1, 1]} : vector<2x32xf32> to vector<2x8xf32>
    %cst_90 = arith.constant 0.000000e+00 : f32
    %249 = vector.broadcast %cst_90 : f32 to vector<2x8xf32>
    %250 = arith.subf %249, %248 : vector<2x8xf32>
    %251 = math.exp %250 : vector<2x8xf32>
    %cst_91 = arith.constant 1.000000e+00 : f32
    %252 = vector.broadcast %cst_91 : f32 to vector<2x8xf32>
    %253 = arith.addf %252, %251 : vector<2x8xf32>
    %cst_92 = arith.constant 1.000000e+00 : f32
    %254 = vector.broadcast %cst_92 : f32 to vector<2x8xf32>
    %255 = arith.divf %254, %253 : vector<2x8xf32>
    %256 = arith.mulf %245, %224 : vector<2x8xf32>
    %257 = arith.mulf %237, %247 : vector<2x8xf32>
    %258 = arith.addf %256, %257 : vector<2x8xf32>
    %259 = math.tanh %258 : vector<2x8xf32>
    %260 = arith.mulf %255, %259 : vector<2x8xf32>
    %261 = vector.extract_strided_slice %19 {offsets = [14, 0], sizes = [2, 32], strides = [1, 1]} : vector<16x32xf32> to vector<2x32xf32>
    %cst_93 = arith.constant dense<0.000000e+00> : vector<2x32xf32>
    %262 = tpu.matmul %260, %1, %cst_93 {dimension_numbers = #tpu.dot_dimension_numbers<[1], [0], [0], [1], [0, 0, 1, 1], [], []>} : vector<2x8xf32>, vector<8x32xf32>, vector<2x32xf32> -> vector<2x32xf32>
    %263 = arith.addf %261, %262 : vector<2x32xf32>
    %264 = vector.extract_strided_slice %263 {offsets = [0, 0], sizes = [2, 8], strides = [1, 1]} : vector<2x32xf32> to vector<2x8xf32>
    %cst_94 = arith.constant 0.000000e+00 : f32
    %265 = vector.broadcast %cst_94 : f32 to vector<2x8xf32>
    %266 = arith.subf %265, %264 : vector<2x8xf32>
    %267 = math.exp %266 : vector<2x8xf32>
    %cst_95 = arith.constant 1.000000e+00 : f32
    %268 = vector.broadcast %cst_95 : f32 to vector<2x8xf32>
    %269 = arith.addf %268, %267 : vector<2x8xf32>
    %cst_96 = arith.constant 1.000000e+00 : f32
    %270 = vector.broadcast %cst_96 : f32 to vector<2x8xf32>
    %271 = arith.divf %270, %269 : vector<2x8xf32>
    %272 = vector.extract_strided_slice %263 {offsets = [0, 8], sizes = [2, 8], strides = [1, 1]} : vector<2x32xf32> to vector<2x8xf32>
    %cst_97 = arith.constant 0.000000e+00 : f32
    %273 = vector.broadcast %cst_97 : f32 to vector<2x8xf32>
    %274 = arith.subf %273, %272 : vector<2x8xf32>
    %275 = math.exp %274 : vector<2x8xf32>
    %cst_98 = arith.constant 1.000000e+00 : f32
    %276 = vector.broadcast %cst_98 : f32 to vector<2x8xf32>
    %277 = arith.addf %276, %275 : vector<2x8xf32>
    %cst_99 = arith.constant 1.000000e+00 : f32
    %278 = vector.broadcast %cst_99 : f32 to vector<2x8xf32>
    %279 = arith.divf %278, %277 : vector<2x8xf32>
    %280 = vector.extract_strided_slice %263 {offsets = [0, 16], sizes = [2, 8], strides = [1, 1]} : vector<2x32xf32> to vector<2x8xf32>
    %281 = math.tanh %280 : vector<2x8xf32>
    %282 = vector.extract_strided_slice %263 {offsets = [0, 24], sizes = [2, 8], strides = [1, 1]} : vector<2x32xf32> to vector<2x8xf32>
    %cst_100 = arith.constant 0.000000e+00 : f32
    %283 = vector.broadcast %cst_100 : f32 to vector<2x8xf32>
    %284 = arith.subf %283, %282 : vector<2x8xf32>
    %285 = math.exp %284 : vector<2x8xf32>
    %cst_101 = arith.constant 1.000000e+00 : f32
    %286 = vector.broadcast %cst_101 : f32 to vector<2x8xf32>
    %287 = arith.addf %286, %285 : vector<2x8xf32>
    %cst_102 = arith.constant 1.000000e+00 : f32
    %288 = vector.broadcast %cst_102 : f32 to vector<2x8xf32>
    %289 = arith.divf %288, %287 : vector<2x8xf32>
    %290 = arith.mulf %279, %258 : vector<2x8xf32>
    %291 = arith.mulf %271, %281 : vector<2x8xf32>
    %292 = arith.addf %290, %291 : vector<2x8xf32>
    %293 = math.tanh %292 : vector<2x8xf32>
    %294 = arith.mulf %289, %293 : vector<2x8xf32>
    %cst_103 = arith.constant 0.000000e+00 : f32
    %295 = vector.broadcast %cst_103 : f32 to vector<2x8xf32>
    %cst_104 = arith.constant 0.000000e+00 : f32
    %296 = vector.broadcast %cst_104 : f32 to vector<2x16xf32>
    %297 = tpu.concatenate %295, %295, %56 in 1 : vector<2x8xf32>, vector<2x8xf32>, vector<2x8xf32> -> vector<2x24xf32>
    %cst_105 = arith.constant dense<0.000000e+00> : vector<2x64xf32>
    %298 = tpu.matmul %297, %2, %cst_105 {dimension_numbers = #tpu.dot_dimension_numbers<[1], [0], [0], [1], [0, 0, 1, 1], [], []>} : vector<2x24xf32>, vector<24x64xf32>, vector<2x64xf32> -> vector<2x64xf32>
    %299 = arith.addf %298, %10 : vector<2x64xf32>
    %cst_106 = arith.constant 0.000000e+00 : f32
    %300 = vector.broadcast %cst_106 : f32 to vector<2x64xf32>
    %301 = arith.cmpf ogt, %299, %300 : vector<2x64xf32>
    %cst_107 = arith.constant 2.000000e-01 : f32
    %302 = vector.broadcast %cst_107 : f32 to vector<2x64xf32>
    %303 = arith.mulf %302, %299 : vector<2x64xf32>
    %304 = arith.select %301, %299, %303 : vector<2x64xi1>, vector<2x64xf32>
    %cst_108 = arith.constant dense<0.000000e+00> : vector<2x64xf32>
    %305 = tpu.matmul %304, %3, %cst_108 {dimension_numbers = #tpu.dot_dimension_numbers<[1], [0], [0], [1], [0, 0, 1, 1], [], []>} : vector<2x64xf32>, vector<64x64xf32>, vector<2x64xf32> -> vector<2x64xf32>
    %306 = arith.addf %305, %13 : vector<2x64xf32>
    %cst_109 = arith.constant 0.000000e+00 : f32
    %307 = vector.broadcast %cst_109 : f32 to vector<2x64xf32>
    %308 = arith.cmpf ogt, %306, %307 : vector<2x64xf32>
    %cst_110 = arith.constant 2.000000e-01 : f32
    %309 = vector.broadcast %cst_110 : f32 to vector<2x64xf32>
    %310 = arith.mulf %309, %306 : vector<2x64xf32>
    %311 = arith.select %308, %306, %310 : vector<2x64xi1>, vector<2x64xf32>
    %cst_111 = arith.constant dense<0.000000e+00> : vector<2x16xf32>
    %312 = tpu.matmul %311, %4, %cst_111 {dimension_numbers = #tpu.dot_dimension_numbers<[1], [0], [0], [1], [0, 0, 1, 1], [], []>} : vector<2x64xf32>, vector<64x16xf32>, vector<2x16xf32> -> vector<2x16xf32>
    %313 = arith.addf %312, %16 : vector<2x16xf32>
    %314 = vector.extract_strided_slice %313 {offsets = [0, 0], sizes = [2, 8], strides = [1, 1]} : vector<2x16xf32> to vector<2x8xf32>
    %cst_112 = arith.constant 0.000000e+00 : f32
    %315 = vector.broadcast %cst_112 : f32 to vector<2x8xf32>
    %316 = arith.cmpf ogt, %314, %315 : vector<2x8xf32>
    %cst_113 = arith.constant 2.000000e-01 : f32
    %317 = vector.broadcast %cst_113 : f32 to vector<2x8xf32>
    %318 = arith.mulf %317, %314 : vector<2x8xf32>
    %319 = arith.select %316, %314, %318 : vector<2x8xi1>, vector<2x8xf32>
    %320 = vector.extract_strided_slice %313 {offsets = [0, 8], sizes = [2, 8], strides = [1, 1]} : vector<2x16xf32> to vector<2x8xf32>
    %cst_114 = arith.constant dense<0xFF800000> : vector<2xf32>
    %321 = vector.multi_reduction <maximumf>, %320, %cst_114 [1] : vector<2x8xf32> to vector<2xf32>
    %322 = vector.shape_cast %321 : vector<2xf32> to vector<2x1xf32>
    %323 = vector.broadcast %322 : vector<2x1xf32> to vector<2x8xf32>
    %324 = arith.subf %320, %323 : vector<2x8xf32>
    %325 = math.exp %324 : vector<2x8xf32>
    %cst_115 = arith.constant dense<0.000000e+00> : vector<2xf32>
    %326 = vector.multi_reduction <add>, %325, %cst_115 [1] : vector<2x8xf32> to vector<2xf32>
    %327 = vector.shape_cast %326 : vector<2xf32> to vector<2x1xf32>
    %328 = vector.broadcast %327 : vector<2x1xf32> to vector<2x8xf32>
    %329 = arith.divf %325, %328 : vector<2x8xf32>
    %cst_116 = arith.constant 5.000000e-01 : f32
    %330 = vector.broadcast %cst_116 : f32 to vector<2x8xf32>
    %331 = arith.mulf %329, %330 : vector<2x8xf32>
    %332 = math.exp %331 : vector<2x8xf32>
    %333 = vector.extract_strided_slice %20 {offsets = [0, 0], sizes = [2, 8], strides = [1, 1]} : vector<16x8xf32> to vector<2x8xf32>
    %334 = arith.mulf %333, %332 : vector<2x8xf32>
    %335 = arith.addf %319, %334 : vector<2x8xf32>
    %336 = tpu.concatenate %295, %335, %90 in 1 : vector<2x8xf32>, vector<2x8xf32>, vector<2x8xf32> -> vector<2x24xf32>
    %cst_117 = arith.constant dense<0.000000e+00> : vector<2x64xf32>
    %337 = tpu.matmul %336, %2, %cst_117 {dimension_numbers = #tpu.dot_dimension_numbers<[1], [0], [0], [1], [0, 0, 1, 1], [], []>} : vector<2x24xf32>, vector<24x64xf32>, vector<2x64xf32> -> vector<2x64xf32>
    %338 = arith.addf %337, %10 : vector<2x64xf32>
    %cst_118 = arith.constant 0.000000e+00 : f32
    %339 = vector.broadcast %cst_118 : f32 to vector<2x64xf32>
    %340 = arith.cmpf ogt, %338, %339 : vector<2x64xf32>
    %cst_119 = arith.constant 2.000000e-01 : f32
    %341 = vector.broadcast %cst_119 : f32 to vector<2x64xf32>
    %342 = arith.mulf %341, %338 : vector<2x64xf32>
    %343 = arith.select %340, %338, %342 : vector<2x64xi1>, vector<2x64xf32>
    %cst_120 = arith.constant dense<0.000000e+00> : vector<2x64xf32>
    %344 = tpu.matmul %343, %3, %cst_120 {dimension_numbers = #tpu.dot_dimension_numbers<[1], [0], [0], [1], [0, 0, 1, 1], [], []>} : vector<2x64xf32>, vector<64x64xf32>, vector<2x64xf32> -> vector<2x64xf32>
    %345 = arith.addf %344, %13 : vector<2x64xf32>
    %cst_121 = arith.constant 0.000000e+00 : f32
    %346 = vector.broadcast %cst_121 : f32 to vector<2x64xf32>
    %347 = arith.cmpf ogt, %345, %346 : vector<2x64xf32>
    %cst_122 = arith.constant 2.000000e-01 : f32
    %348 = vector.broadcast %cst_122 : f32 to vector<2x64xf32>
    %349 = arith.mulf %348, %345 : vector<2x64xf32>
    %350 = arith.select %347, %345, %349 : vector<2x64xi1>, vector<2x64xf32>
    %cst_123 = arith.constant dense<0.000000e+00> : vector<2x16xf32>
    %351 = tpu.matmul %350, %4, %cst_123 {dimension_numbers = #tpu.dot_dimension_numbers<[1], [0], [0], [1], [0, 0, 1, 1], [], []>} : vector<2x64xf32>, vector<64x16xf32>, vector<2x16xf32> -> vector<2x16xf32>
    %352 = arith.addf %351, %16 : vector<2x16xf32>
    %353 = vector.extract_strided_slice %352 {offsets = [0, 0], sizes = [2, 8], strides = [1, 1]} : vector<2x16xf32> to vector<2x8xf32>
    %cst_124 = arith.constant 0.000000e+00 : f32
    %354 = vector.broadcast %cst_124 : f32 to vector<2x8xf32>
    %355 = arith.cmpf ogt, %353, %354 : vector<2x8xf32>
    %cst_125 = arith.constant 2.000000e-01 : f32
    %356 = vector.broadcast %cst_125 : f32 to vector<2x8xf32>
    %357 = arith.mulf %356, %353 : vector<2x8xf32>
    %358 = arith.select %355, %353, %357 : vector<2x8xi1>, vector<2x8xf32>
    %359 = vector.extract_strided_slice %352 {offsets = [0, 8], sizes = [2, 8], strides = [1, 1]} : vector<2x16xf32> to vector<2x8xf32>
    %cst_126 = arith.constant dense<0xFF800000> : vector<2xf32>
    %360 = vector.multi_reduction <maximumf>, %359, %cst_126 [1] : vector<2x8xf32> to vector<2xf32>
    %361 = vector.shape_cast %360 : vector<2xf32> to vector<2x1xf32>
    %362 = vector.broadcast %361 : vector<2x1xf32> to vector<2x8xf32>
    %363 = arith.subf %359, %362 : vector<2x8xf32>
    %364 = math.exp %363 : vector<2x8xf32>
    %cst_127 = arith.constant dense<0.000000e+00> : vector<2xf32>
    %365 = vector.multi_reduction <add>, %364, %cst_127 [1] : vector<2x8xf32> to vector<2xf32>
    %366 = vector.shape_cast %365 : vector<2xf32> to vector<2x1xf32>
    %367 = vector.broadcast %366 : vector<2x1xf32> to vector<2x8xf32>
    %368 = arith.divf %364, %367 : vector<2x8xf32>
    %cst_128 = arith.constant 5.000000e-01 : f32
    %369 = vector.broadcast %cst_128 : f32 to vector<2x8xf32>
    %370 = arith.mulf %368, %369 : vector<2x8xf32>
    %371 = math.exp %370 : vector<2x8xf32>
    %372 = vector.extract_strided_slice %20 {offsets = [2, 0], sizes = [2, 8], strides = [1, 1]} : vector<16x8xf32> to vector<2x8xf32>
    %373 = arith.mulf %372, %371 : vector<2x8xf32>
    %374 = arith.addf %358, %373 : vector<2x8xf32>
    %375 = tpu.concatenate %335, %374, %124 in 1 : vector<2x8xf32>, vector<2x8xf32>, vector<2x8xf32> -> vector<2x24xf32>
    %cst_129 = arith.constant dense<0.000000e+00> : vector<2x64xf32>
    %376 = tpu.matmul %375, %2, %cst_129 {dimension_numbers = #tpu.dot_dimension_numbers<[1], [0], [0], [1], [0, 0, 1, 1], [], []>} : vector<2x24xf32>, vector<24x64xf32>, vector<2x64xf32> -> vector<2x64xf32>
    %377 = arith.addf %376, %10 : vector<2x64xf32>
    %cst_130 = arith.constant 0.000000e+00 : f32
    %378 = vector.broadcast %cst_130 : f32 to vector<2x64xf32>
    %379 = arith.cmpf ogt, %377, %378 : vector<2x64xf32>
    %cst_131 = arith.constant 2.000000e-01 : f32
    %380 = vector.broadcast %cst_131 : f32 to vector<2x64xf32>
    %381 = arith.mulf %380, %377 : vector<2x64xf32>
    %382 = arith.select %379, %377, %381 : vector<2x64xi1>, vector<2x64xf32>
    %cst_132 = arith.constant dense<0.000000e+00> : vector<2x64xf32>
    %383 = tpu.matmul %382, %3, %cst_132 {dimension_numbers = #tpu.dot_dimension_numbers<[1], [0], [0], [1], [0, 0, 1, 1], [], []>} : vector<2x64xf32>, vector<64x64xf32>, vector<2x64xf32> -> vector<2x64xf32>
    %384 = arith.addf %383, %13 : vector<2x64xf32>
    %cst_133 = arith.constant 0.000000e+00 : f32
    %385 = vector.broadcast %cst_133 : f32 to vector<2x64xf32>
    %386 = arith.cmpf ogt, %384, %385 : vector<2x64xf32>
    %cst_134 = arith.constant 2.000000e-01 : f32
    %387 = vector.broadcast %cst_134 : f32 to vector<2x64xf32>
    %388 = arith.mulf %387, %384 : vector<2x64xf32>
    %389 = arith.select %386, %384, %388 : vector<2x64xi1>, vector<2x64xf32>
    %cst_135 = arith.constant dense<0.000000e+00> : vector<2x16xf32>
    %390 = tpu.matmul %389, %4, %cst_135 {dimension_numbers = #tpu.dot_dimension_numbers<[1], [0], [0], [1], [0, 0, 1, 1], [], []>} : vector<2x64xf32>, vector<64x16xf32>, vector<2x16xf32> -> vector<2x16xf32>
    %391 = arith.addf %390, %16 : vector<2x16xf32>
    %392 = vector.extract_strided_slice %391 {offsets = [0, 0], sizes = [2, 8], strides = [1, 1]} : vector<2x16xf32> to vector<2x8xf32>
    %cst_136 = arith.constant 0.000000e+00 : f32
    %393 = vector.broadcast %cst_136 : f32 to vector<2x8xf32>
    %394 = arith.cmpf ogt, %392, %393 : vector<2x8xf32>
    %cst_137 = arith.constant 2.000000e-01 : f32
    %395 = vector.broadcast %cst_137 : f32 to vector<2x8xf32>
    %396 = arith.mulf %395, %392 : vector<2x8xf32>
    %397 = arith.select %394, %392, %396 : vector<2x8xi1>, vector<2x8xf32>
    %398 = vector.extract_strided_slice %391 {offsets = [0, 8], sizes = [2, 8], strides = [1, 1]} : vector<2x16xf32> to vector<2x8xf32>
    %cst_138 = arith.constant dense<0xFF800000> : vector<2xf32>
    %399 = vector.multi_reduction <maximumf>, %398, %cst_138 [1] : vector<2x8xf32> to vector<2xf32>
    %400 = vector.shape_cast %399 : vector<2xf32> to vector<2x1xf32>
    %401 = vector.broadcast %400 : vector<2x1xf32> to vector<2x8xf32>
    %402 = arith.subf %398, %401 : vector<2x8xf32>
    %403 = math.exp %402 : vector<2x8xf32>
    %cst_139 = arith.constant dense<0.000000e+00> : vector<2xf32>
    %404 = vector.multi_reduction <add>, %403, %cst_139 [1] : vector<2x8xf32> to vector<2xf32>
    %405 = vector.shape_cast %404 : vector<2xf32> to vector<2x1xf32>
    %406 = vector.broadcast %405 : vector<2x1xf32> to vector<2x8xf32>
    %407 = arith.divf %403, %406 : vector<2x8xf32>
    %cst_140 = arith.constant 5.000000e-01 : f32
    %408 = vector.broadcast %cst_140 : f32 to vector<2x8xf32>
    %409 = arith.mulf %407, %408 : vector<2x8xf32>
    %410 = math.exp %409 : vector<2x8xf32>
    %411 = vector.extract_strided_slice %20 {offsets = [4, 0], sizes = [2, 8], strides = [1, 1]} : vector<16x8xf32> to vector<2x8xf32>
    %412 = arith.mulf %411, %410 : vector<2x8xf32>
    %413 = arith.addf %397, %412 : vector<2x8xf32>
    %414 = tpu.concatenate %374, %413, %158 in 1 : vector<2x8xf32>, vector<2x8xf32>, vector<2x8xf32> -> vector<2x24xf32>
    %cst_141 = arith.constant dense<0.000000e+00> : vector<2x64xf32>
    %415 = tpu.matmul %414, %2, %cst_141 {dimension_numbers = #tpu.dot_dimension_numbers<[1], [0], [0], [1], [0, 0, 1, 1], [], []>} : vector<2x24xf32>, vector<24x64xf32>, vector<2x64xf32> -> vector<2x64xf32>
    %416 = arith.addf %415, %10 : vector<2x64xf32>
    %cst_142 = arith.constant 0.000000e+00 : f32
    %417 = vector.broadcast %cst_142 : f32 to vector<2x64xf32>
    %418 = arith.cmpf ogt, %416, %417 : vector<2x64xf32>
    %cst_143 = arith.constant 2.000000e-01 : f32
    %419 = vector.broadcast %cst_143 : f32 to vector<2x64xf32>
    %420 = arith.mulf %419, %416 : vector<2x64xf32>
    %421 = arith.select %418, %416, %420 : vector<2x64xi1>, vector<2x64xf32>
    %cst_144 = arith.constant dense<0.000000e+00> : vector<2x64xf32>
    %422 = tpu.matmul %421, %3, %cst_144 {dimension_numbers = #tpu.dot_dimension_numbers<[1], [0], [0], [1], [0, 0, 1, 1], [], []>} : vector<2x64xf32>, vector<64x64xf32>, vector<2x64xf32> -> vector<2x64xf32>
    %423 = arith.addf %422, %13 : vector<2x64xf32>
    %cst_145 = arith.constant 0.000000e+00 : f32
    %424 = vector.broadcast %cst_145 : f32 to vector<2x64xf32>
    %425 = arith.cmpf ogt, %423, %424 : vector<2x64xf32>
    %cst_146 = arith.constant 2.000000e-01 : f32
    %426 = vector.broadcast %cst_146 : f32 to vector<2x64xf32>
    %427 = arith.mulf %426, %423 : vector<2x64xf32>
    %428 = arith.select %425, %423, %427 : vector<2x64xi1>, vector<2x64xf32>
    %cst_147 = arith.constant dense<0.000000e+00> : vector<2x16xf32>
    %429 = tpu.matmul %428, %4, %cst_147 {dimension_numbers = #tpu.dot_dimension_numbers<[1], [0], [0], [1], [0, 0, 1, 1], [], []>} : vector<2x64xf32>, vector<64x16xf32>, vector<2x16xf32> -> vector<2x16xf32>
    %430 = arith.addf %429, %16 : vector<2x16xf32>
    %431 = vector.extract_strided_slice %430 {offsets = [0, 0], sizes = [2, 8], strides = [1, 1]} : vector<2x16xf32> to vector<2x8xf32>
    %cst_148 = arith.constant 0.000000e+00 : f32
    %432 = vector.broadcast %cst_148 : f32 to vector<2x8xf32>
    %433 = arith.cmpf ogt, %431, %432 : vector<2x8xf32>
    %cst_149 = arith.constant 2.000000e-01 : f32
    %434 = vector.broadcast %cst_149 : f32 to vector<2x8xf32>
    %435 = arith.mulf %434, %431 : vector<2x8xf32>
    %436 = arith.select %433, %431, %435 : vector<2x8xi1>, vector<2x8xf32>
    %437 = vector.extract_strided_slice %430 {offsets = [0, 8], sizes = [2, 8], strides = [1, 1]} : vector<2x16xf32> to vector<2x8xf32>
    %cst_150 = arith.constant dense<0xFF800000> : vector<2xf32>
    %438 = vector.multi_reduction <maximumf>, %437, %cst_150 [1] : vector<2x8xf32> to vector<2xf32>
    %439 = vector.shape_cast %438 : vector<2xf32> to vector<2x1xf32>
    %440 = vector.broadcast %439 : vector<2x1xf32> to vector<2x8xf32>
    %441 = arith.subf %437, %440 : vector<2x8xf32>
    %442 = math.exp %441 : vector<2x8xf32>
    %cst_151 = arith.constant dense<0.000000e+00> : vector<2xf32>
    %443 = vector.multi_reduction <add>, %442, %cst_151 [1] : vector<2x8xf32> to vector<2xf32>
    %444 = vector.shape_cast %443 : vector<2xf32> to vector<2x1xf32>
    %445 = vector.broadcast %444 : vector<2x1xf32> to vector<2x8xf32>
    %446 = arith.divf %442, %445 : vector<2x8xf32>
    %cst_152 = arith.constant 5.000000e-01 : f32
    %447 = vector.broadcast %cst_152 : f32 to vector<2x8xf32>
    %448 = arith.mulf %446, %447 : vector<2x8xf32>
    %449 = math.exp %448 : vector<2x8xf32>
    %450 = vector.extract_strided_slice %20 {offsets = [6, 0], sizes = [2, 8], strides = [1, 1]} : vector<16x8xf32> to vector<2x8xf32>
    %451 = arith.mulf %450, %449 : vector<2x8xf32>
    %452 = arith.addf %436, %451 : vector<2x8xf32>
    %453 = tpu.concatenate %413, %452, %192 in 1 : vector<2x8xf32>, vector<2x8xf32>, vector<2x8xf32> -> vector<2x24xf32>
    %cst_153 = arith.constant dense<0.000000e+00> : vector<2x64xf32>
    %454 = tpu.matmul %453, %2, %cst_153 {dimension_numbers = #tpu.dot_dimension_numbers<[1], [0], [0], [1], [0, 0, 1, 1], [], []>} : vector<2x24xf32>, vector<24x64xf32>, vector<2x64xf32> -> vector<2x64xf32>
    %455 = arith.addf %454, %10 : vector<2x64xf32>
    %cst_154 = arith.constant 0.000000e+00 : f32
    %456 = vector.broadcast %cst_154 : f32 to vector<2x64xf32>
    %457 = arith.cmpf ogt, %455, %456 : vector<2x64xf32>
    %cst_155 = arith.constant 2.000000e-01 : f32
    %458 = vector.broadcast %cst_155 : f32 to vector<2x64xf32>
    %459 = arith.mulf %458, %455 : vector<2x64xf32>
    %460 = arith.select %457, %455, %459 : vector<2x64xi1>, vector<2x64xf32>
    %cst_156 = arith.constant dense<0.000000e+00> : vector<2x64xf32>
    %461 = tpu.matmul %460, %3, %cst_156 {dimension_numbers = #tpu.dot_dimension_numbers<[1], [0], [0], [1], [0, 0, 1, 1], [], []>} : vector<2x64xf32>, vector<64x64xf32>, vector<2x64xf32> -> vector<2x64xf32>
    %462 = arith.addf %461, %13 : vector<2x64xf32>
    %cst_157 = arith.constant 0.000000e+00 : f32
    %463 = vector.broadcast %cst_157 : f32 to vector<2x64xf32>
    %464 = arith.cmpf ogt, %462, %463 : vector<2x64xf32>
    %cst_158 = arith.constant 2.000000e-01 : f32
    %465 = vector.broadcast %cst_158 : f32 to vector<2x64xf32>
    %466 = arith.mulf %465, %462 : vector<2x64xf32>
    %467 = arith.select %464, %462, %466 : vector<2x64xi1>, vector<2x64xf32>
    %cst_159 = arith.constant dense<0.000000e+00> : vector<2x16xf32>
    %468 = tpu.matmul %467, %4, %cst_159 {dimension_numbers = #tpu.dot_dimension_numbers<[1], [0], [0], [1], [0, 0, 1, 1], [], []>} : vector<2x64xf32>, vector<64x16xf32>, vector<2x16xf32> -> vector<2x16xf32>
    %469 = arith.addf %468, %16 : vector<2x16xf32>
    %470 = vector.extract_strided_slice %469 {offsets = [0, 0], sizes = [2, 8], strides = [1, 1]} : vector<2x16xf32> to vector<2x8xf32>
    %cst_160 = arith.constant 0.000000e+00 : f32
    %471 = vector.broadcast %cst_160 : f32 to vector<2x8xf32>
    %472 = arith.cmpf ogt, %470, %471 : vector<2x8xf32>
    %cst_161 = arith.constant 2.000000e-01 : f32
    %473 = vector.broadcast %cst_161 : f32 to vector<2x8xf32>
    %474 = arith.mulf %473, %470 : vector<2x8xf32>
    %475 = arith.select %472, %470, %474 : vector<2x8xi1>, vector<2x8xf32>
    %476 = vector.extract_strided_slice %469 {offsets = [0, 8], sizes = [2, 8], strides = [1, 1]} : vector<2x16xf32> to vector<2x8xf32>
    %cst_162 = arith.constant dense<0xFF800000> : vector<2xf32>
    %477 = vector.multi_reduction <maximumf>, %476, %cst_162 [1] : vector<2x8xf32> to vector<2xf32>
    %478 = vector.shape_cast %477 : vector<2xf32> to vector<2x1xf32>
    %479 = vector.broadcast %478 : vector<2x1xf32> to vector<2x8xf32>
    %480 = arith.subf %476, %479 : vector<2x8xf32>
    %481 = math.exp %480 : vector<2x8xf32>
    %cst_163 = arith.constant dense<0.000000e+00> : vector<2xf32>
    %482 = vector.multi_reduction <add>, %481, %cst_163 [1] : vector<2x8xf32> to vector<2xf32>
    %483 = vector.shape_cast %482 : vector<2xf32> to vector<2x1xf32>
    %484 = vector.broadcast %483 : vector<2x1xf32> to vector<2x8xf32>
    %485 = arith.divf %481, %484 : vector<2x8xf32>
    %cst_164 = arith.constant 5.000000e-01 : f32
    %486 = vector.broadcast %cst_164 : f32 to vector<2x8xf32>
    %487 = arith.mulf %485, %486 : vector<2x8xf32>
    %488 = math.exp %487 : vector<2x8xf32>
    %489 = vector.extract_strided_slice %20 {offsets = [8, 0], sizes = [2, 8], strides = [1, 1]} : vector<16x8xf32> to vector<2x8xf32>
    %490 = arith.mulf %489, %488 : vector<2x8xf32>
    %491 = arith.addf %475, %490 : vector<2x8xf32>
    %492 = tpu.concatenate %452, %491, %226 in 1 : vector<2x8xf32>, vector<2x8xf32>, vector<2x8xf32> -> vector<2x24xf32>
    %cst_165 = arith.constant dense<0.000000e+00> : vector<2x64xf32>
    %493 = tpu.matmul %492, %2, %cst_165 {dimension_numbers = #tpu.dot_dimension_numbers<[1], [0], [0], [1], [0, 0, 1, 1], [], []>} : vector<2x24xf32>, vector<24x64xf32>, vector<2x64xf32> -> vector<2x64xf32>
    %494 = arith.addf %493, %10 : vector<2x64xf32>
    %cst_166 = arith.constant 0.000000e+00 : f32
    %495 = vector.broadcast %cst_166 : f32 to vector<2x64xf32>
    %496 = arith.cmpf ogt, %494, %495 : vector<2x64xf32>
    %cst_167 = arith.constant 2.000000e-01 : f32
    %497 = vector.broadcast %cst_167 : f32 to vector<2x64xf32>
    %498 = arith.mulf %497, %494 : vector<2x64xf32>
    %499 = arith.select %496, %494, %498 : vector<2x64xi1>, vector<2x64xf32>
    %cst_168 = arith.constant dense<0.000000e+00> : vector<2x64xf32>
    %500 = tpu.matmul %499, %3, %cst_168 {dimension_numbers = #tpu.dot_dimension_numbers<[1], [0], [0], [1], [0, 0, 1, 1], [], []>} : vector<2x64xf32>, vector<64x64xf32>, vector<2x64xf32> -> vector<2x64xf32>
    %501 = arith.addf %500, %13 : vector<2x64xf32>
    %cst_169 = arith.constant 0.000000e+00 : f32
    %502 = vector.broadcast %cst_169 : f32 to vector<2x64xf32>
    %503 = arith.cmpf ogt, %501, %502 : vector<2x64xf32>
    %cst_170 = arith.constant 2.000000e-01 : f32
    %504 = vector.broadcast %cst_170 : f32 to vector<2x64xf32>
    %505 = arith.mulf %504, %501 : vector<2x64xf32>
    %506 = arith.select %503, %501, %505 : vector<2x64xi1>, vector<2x64xf32>
    %cst_171 = arith.constant dense<0.000000e+00> : vector<2x16xf32>
    %507 = tpu.matmul %506, %4, %cst_171 {dimension_numbers = #tpu.dot_dimension_numbers<[1], [0], [0], [1], [0, 0, 1, 1], [], []>} : vector<2x64xf32>, vector<64x16xf32>, vector<2x16xf32> -> vector<2x16xf32>
    %508 = arith.addf %507, %16 : vector<2x16xf32>
    %509 = vector.extract_strided_slice %508 {offsets = [0, 0], sizes = [2, 8], strides = [1, 1]} : vector<2x16xf32> to vector<2x8xf32>
    %cst_172 = arith.constant 0.000000e+00 : f32
    %510 = vector.broadcast %cst_172 : f32 to vector<2x8xf32>
    %511 = arith.cmpf ogt, %509, %510 : vector<2x8xf32>
    %cst_173 = arith.constant 2.000000e-01 : f32
    %512 = vector.broadcast %cst_173 : f32 to vector<2x8xf32>
    %513 = arith.mulf %512, %509 : vector<2x8xf32>
    %514 = arith.select %511, %509, %513 : vector<2x8xi1>, vector<2x8xf32>
    %515 = vector.extract_strided_slice %508 {offsets = [0, 8], sizes = [2, 8], strides = [1, 1]} : vector<2x16xf32> to vector<2x8xf32>
    %cst_174 = arith.constant dense<0xFF800000> : vector<2xf32>
    %516 = vector.multi_reduction <maximumf>, %515, %cst_174 [1] : vector<2x8xf32> to vector<2xf32>
    %517 = vector.shape_cast %516 : vector<2xf32> to vector<2x1xf32>
    %518 = vector.broadcast %517 : vector<2x1xf32> to vector<2x8xf32>
    %519 = arith.subf %515, %518 : vector<2x8xf32>
    %520 = math.exp %519 : vector<2x8xf32>
    %cst_175 = arith.constant dense<0.000000e+00> : vector<2xf32>
    %521 = vector.multi_reduction <add>, %520, %cst_175 [1] : vector<2x8xf32> to vector<2xf32>
    %522 = vector.shape_cast %521 : vector<2xf32> to vector<2x1xf32>
    %523 = vector.broadcast %522 : vector<2x1xf32> to vector<2x8xf32>
    %524 = arith.divf %520, %523 : vector<2x8xf32>
    %cst_176 = arith.constant 5.000000e-01 : f32
    %525 = vector.broadcast %cst_176 : f32 to vector<2x8xf32>
    %526 = arith.mulf %524, %525 : vector<2x8xf32>
    %527 = math.exp %526 : vector<2x8xf32>
    %528 = vector.extract_strided_slice %20 {offsets = [10, 0], sizes = [2, 8], strides = [1, 1]} : vector<16x8xf32> to vector<2x8xf32>
    %529 = arith.mulf %528, %527 : vector<2x8xf32>
    %530 = arith.addf %514, %529 : vector<2x8xf32>
    %531 = tpu.concatenate %491, %530, %260 in 1 : vector<2x8xf32>, vector<2x8xf32>, vector<2x8xf32> -> vector<2x24xf32>
    %cst_177 = arith.constant dense<0.000000e+00> : vector<2x64xf32>
    %532 = tpu.matmul %531, %2, %cst_177 {dimension_numbers = #tpu.dot_dimension_numbers<[1], [0], [0], [1], [0, 0, 1, 1], [], []>} : vector<2x24xf32>, vector<24x64xf32>, vector<2x64xf32> -> vector<2x64xf32>
    %533 = arith.addf %532, %10 : vector<2x64xf32>
    %cst_178 = arith.constant 0.000000e+00 : f32
    %534 = vector.broadcast %cst_178 : f32 to vector<2x64xf32>
    %535 = arith.cmpf ogt, %533, %534 : vector<2x64xf32>
    %cst_179 = arith.constant 2.000000e-01 : f32
    %536 = vector.broadcast %cst_179 : f32 to vector<2x64xf32>
    %537 = arith.mulf %536, %533 : vector<2x64xf32>
    %538 = arith.select %535, %533, %537 : vector<2x64xi1>, vector<2x64xf32>
    %cst_180 = arith.constant dense<0.000000e+00> : vector<2x64xf32>
    %539 = tpu.matmul %538, %3, %cst_180 {dimension_numbers = #tpu.dot_dimension_numbers<[1], [0], [0], [1], [0, 0, 1, 1], [], []>} : vector<2x64xf32>, vector<64x64xf32>, vector<2x64xf32> -> vector<2x64xf32>
    %540 = arith.addf %539, %13 : vector<2x64xf32>
    %cst_181 = arith.constant 0.000000e+00 : f32
    %541 = vector.broadcast %cst_181 : f32 to vector<2x64xf32>
    %542 = arith.cmpf ogt, %540, %541 : vector<2x64xf32>
    %cst_182 = arith.constant 2.000000e-01 : f32
    %543 = vector.broadcast %cst_182 : f32 to vector<2x64xf32>
    %544 = arith.mulf %543, %540 : vector<2x64xf32>
    %545 = arith.select %542, %540, %544 : vector<2x64xi1>, vector<2x64xf32>
    %cst_183 = arith.constant dense<0.000000e+00> : vector<2x16xf32>
    %546 = tpu.matmul %545, %4, %cst_183 {dimension_numbers = #tpu.dot_dimension_numbers<[1], [0], [0], [1], [0, 0, 1, 1], [], []>} : vector<2x64xf32>, vector<64x16xf32>, vector<2x16xf32> -> vector<2x16xf32>
    %547 = arith.addf %546, %16 : vector<2x16xf32>
    %548 = vector.extract_strided_slice %547 {offsets = [0, 0], sizes = [2, 8], strides = [1, 1]} : vector<2x16xf32> to vector<2x8xf32>
    %cst_184 = arith.constant 0.000000e+00 : f32
    %549 = vector.broadcast %cst_184 : f32 to vector<2x8xf32>
    %550 = arith.cmpf ogt, %548, %549 : vector<2x8xf32>
    %cst_185 = arith.constant 2.000000e-01 : f32
    %551 = vector.broadcast %cst_185 : f32 to vector<2x8xf32>
    %552 = arith.mulf %551, %548 : vector<2x8xf32>
    %553 = arith.select %550, %548, %552 : vector<2x8xi1>, vector<2x8xf32>
    %554 = vector.extract_strided_slice %547 {offsets = [0, 8], sizes = [2, 8], strides = [1, 1]} : vector<2x16xf32> to vector<2x8xf32>
    %cst_186 = arith.constant dense<0xFF800000> : vector<2xf32>
    %555 = vector.multi_reduction <maximumf>, %554, %cst_186 [1] : vector<2x8xf32> to vector<2xf32>
    %556 = vector.shape_cast %555 : vector<2xf32> to vector<2x1xf32>
    %557 = vector.broadcast %556 : vector<2x1xf32> to vector<2x8xf32>
    %558 = arith.subf %554, %557 : vector<2x8xf32>
    %559 = math.exp %558 : vector<2x8xf32>
    %cst_187 = arith.constant dense<0.000000e+00> : vector<2xf32>
    %560 = vector.multi_reduction <add>, %559, %cst_187 [1] : vector<2x8xf32> to vector<2xf32>
    %561 = vector.shape_cast %560 : vector<2xf32> to vector<2x1xf32>
    %562 = vector.broadcast %561 : vector<2x1xf32> to vector<2x8xf32>
    %563 = arith.divf %559, %562 : vector<2x8xf32>
    %cst_188 = arith.constant 5.000000e-01 : f32
    %564 = vector.broadcast %cst_188 : f32 to vector<2x8xf32>
    %565 = arith.mulf %563, %564 : vector<2x8xf32>
    %566 = math.exp %565 : vector<2x8xf32>
    %567 = vector.extract_strided_slice %20 {offsets = [12, 0], sizes = [2, 8], strides = [1, 1]} : vector<16x8xf32> to vector<2x8xf32>
    %568 = arith.mulf %567, %566 : vector<2x8xf32>
    %569 = arith.addf %553, %568 : vector<2x8xf32>
    %570 = tpu.concatenate %530, %569, %294 in 1 : vector<2x8xf32>, vector<2x8xf32>, vector<2x8xf32> -> vector<2x24xf32>
    %cst_189 = arith.constant dense<0.000000e+00> : vector<2x64xf32>
    %571 = tpu.matmul %570, %2, %cst_189 {dimension_numbers = #tpu.dot_dimension_numbers<[1], [0], [0], [1], [0, 0, 1, 1], [], []>} : vector<2x24xf32>, vector<24x64xf32>, vector<2x64xf32> -> vector<2x64xf32>
    %572 = arith.addf %571, %10 : vector<2x64xf32>
    %cst_190 = arith.constant 0.000000e+00 : f32
    %573 = vector.broadcast %cst_190 : f32 to vector<2x64xf32>
    %574 = arith.cmpf ogt, %572, %573 : vector<2x64xf32>
    %cst_191 = arith.constant 2.000000e-01 : f32
    %575 = vector.broadcast %cst_191 : f32 to vector<2x64xf32>
    %576 = arith.mulf %575, %572 : vector<2x64xf32>
    %577 = arith.select %574, %572, %576 : vector<2x64xi1>, vector<2x64xf32>
    %cst_192 = arith.constant dense<0.000000e+00> : vector<2x64xf32>
    %578 = tpu.matmul %577, %3, %cst_192 {dimension_numbers = #tpu.dot_dimension_numbers<[1], [0], [0], [1], [0, 0, 1, 1], [], []>} : vector<2x64xf32>, vector<64x64xf32>, vector<2x64xf32> -> vector<2x64xf32>
    %579 = arith.addf %578, %13 : vector<2x64xf32>
    %cst_193 = arith.constant 0.000000e+00 : f32
    %580 = vector.broadcast %cst_193 : f32 to vector<2x64xf32>
    %581 = arith.cmpf ogt, %579, %580 : vector<2x64xf32>
    %cst_194 = arith.constant 2.000000e-01 : f32
    %582 = vector.broadcast %cst_194 : f32 to vector<2x64xf32>
    %583 = arith.mulf %582, %579 : vector<2x64xf32>
    %584 = arith.select %581, %579, %583 : vector<2x64xi1>, vector<2x64xf32>
    %cst_195 = arith.constant dense<0.000000e+00> : vector<2x16xf32>
    %585 = tpu.matmul %584, %4, %cst_195 {dimension_numbers = #tpu.dot_dimension_numbers<[1], [0], [0], [1], [0, 0, 1, 1], [], []>} : vector<2x64xf32>, vector<64x16xf32>, vector<2x16xf32> -> vector<2x16xf32>
    %586 = arith.addf %585, %16 : vector<2x16xf32>
    %587 = vector.extract_strided_slice %586 {offsets = [0, 0], sizes = [2, 8], strides = [1, 1]} : vector<2x16xf32> to vector<2x8xf32>
    %cst_196 = arith.constant 0.000000e+00 : f32
    %588 = vector.broadcast %cst_196 : f32 to vector<2x8xf32>
    %589 = arith.cmpf ogt, %587, %588 : vector<2x8xf32>
    %cst_197 = arith.constant 2.000000e-01 : f32
    %590 = vector.broadcast %cst_197 : f32 to vector<2x8xf32>
    %591 = arith.mulf %590, %587 : vector<2x8xf32>
    %592 = arith.select %589, %587, %591 : vector<2x8xi1>, vector<2x8xf32>
    %593 = vector.extract_strided_slice %586 {offsets = [0, 8], sizes = [2, 8], strides = [1, 1]} : vector<2x16xf32> to vector<2x8xf32>
    %cst_198 = arith.constant dense<0xFF800000> : vector<2xf32>
    %594 = vector.multi_reduction <maximumf>, %593, %cst_198 [1] : vector<2x8xf32> to vector<2xf32>
    %595 = vector.shape_cast %594 : vector<2xf32> to vector<2x1xf32>
    %596 = vector.broadcast %595 : vector<2x1xf32> to vector<2x8xf32>
    %597 = arith.subf %593, %596 : vector<2x8xf32>
    %598 = math.exp %597 : vector<2x8xf32>
    %cst_199 = arith.constant dense<0.000000e+00> : vector<2xf32>
    %599 = vector.multi_reduction <add>, %598, %cst_199 [1] : vector<2x8xf32> to vector<2xf32>
    %600 = vector.shape_cast %599 : vector<2xf32> to vector<2x1xf32>
    %601 = vector.broadcast %600 : vector<2x1xf32> to vector<2x8xf32>
    %602 = arith.divf %598, %601 : vector<2x8xf32>
    %cst_200 = arith.constant 5.000000e-01 : f32
    %603 = vector.broadcast %cst_200 : f32 to vector<2x8xf32>
    %604 = arith.mulf %602, %603 : vector<2x8xf32>
    %605 = math.exp %604 : vector<2x8xf32>
    %606 = vector.extract_strided_slice %20 {offsets = [14, 0], sizes = [2, 8], strides = [1, 1]} : vector<16x8xf32> to vector<2x8xf32>
    %607 = arith.mulf %606, %605 : vector<2x8xf32>
    %608 = arith.addf %592, %607 : vector<2x8xf32>
    %609 = tpu.concatenate %296, %335, %374, %413, %452, %491, %530, %569, %608 in 1 : vector<2x16xf32>, vector<2x8xf32>, vector<2x8xf32>, vector<2x8xf32>, vector<2x8xf32>, vector<2x8xf32>, vector<2x8xf32>, vector<2x8xf32>, vector<2x8xf32> -> vector<2x80xf32>
    %c0_201 = arith.constant 0 : index
    %c0_202 = arith.constant 0 : index
    %610 = vector.load %arg11[%c0_201, %c0_202] : memref<2x80xf32, #tpu.memory_space<vmem>>, vector<2x80xf32>
    tpu.vector_store %arg11[%c0_201, %c0_202], %609 {strides = array<i32>} : memref<2x80xf32, #tpu.memory_space<vmem>>, vector<2x80xf32>,
    %611 = tpu.concatenate %319, %358, %397, %436, %475, %514, %553, %592 in 1 : vector<2x8xf32>, vector<2x8xf32>, vector<2x8xf32>, vector<2x8xf32>, vector<2x8xf32>, vector<2x8xf32>, vector<2x8xf32>, vector<2x8xf32> -> vector<2x64xf32>
    %c0_203 = arith.constant 0 : index
    %c0_204 = arith.constant 0 : index
    %612 = vector.load %arg12[%c0_203, %c0_204] : memref<2x64xf32, #tpu.memory_space<vmem>>, vector<2x64xf32>
    tpu.vector_store %arg12[%c0_203, %c0_204], %611 {strides = array<i32>} : memref<2x64xf32, #tpu.memory_space<vmem>>, vector<2x64xf32>,
    %613 = tpu.concatenate %329, %368, %407, %446, %485, %524, %563, %602 in 1 : vector<2x8xf32>, vector<2x8xf32>, vector<2x8xf32>, vector<2x8xf32>, vector<2x8xf32>, vector<2x8xf32>, vector<2x8xf32>, vector<2x8xf32> -> vector<2x64xf32>
    %c0_205 = arith.constant 0 : index
    %c0_206 = arith.constant 0 : index
    %614 = vector.load %arg13[%c0_205, %c0_206] : memref<2x64xf32, #tpu.memory_space<vmem>>, vector<2x64xf32>
    tpu.vector_store %arg13[%c0_205, %c0_206], %613 {strides = array<i32>} : memref<2x64xf32, #tpu.memory_space<vmem>>, vector<2x64xf32>,
    return
  }
}

</mosaic_0001>

<bundles_post_ra>
// kernel: tpu_custom_call.1
= control target key start
LH: loop header
LB: loop body
LE: loop exit
PB: predicated region body
PF: predicated region fallthrough
CT: control target
= control target key end

     0   :  { %19 = vsyncpa [#allocation3], 0  ;;  %vm82_vm0 = vcmask 64512   ;;  %v2090_v3 = vmov 0.0   ;;  %s2880_s0 = inlined_call_operand.vmem [shape: f32[16,8], index: 0, kind: input, shape index: {}]   ;;  %s2881_s1 = inlined_call_operand.vmem [shape: f32[16,8], index: 1, kind: input, shape index: {}]   ;;  %s2882_s2 = inlined_call_operand.vmem [shape: f32[8,32], index: 2, kind: input, shape index: {}]   ;;  %s2883_s3 = inlined_call_operand.vmem [shape: f32[8,32], index: 3, kind: input, shape index: {}]   ;;  %s2884_s4 = inlined_call_operand.vmem [shape: f32[1,32], index: 4, kind: input, shape index: {}]   ;;  %s2885_s5 = inlined_call_operand.vmem [shape: f32[24,64], index: 5, kind: input, shape index: {}]   ;;  %s2886_s6 = inlined_call_operand.vmem [shape: f32[1,64], index: 6, kind: input, shape index: {}]   ;;  %s2887_s7 = inlined_call_operand.vmem [shape: f32[64,64], index: 7, kind: input, shape index: {}]   ;;  %s2888_s8 = inlined_call_operand.vmem [shape: f32[1,64], index: 8, kind: input, shape index: {}]   ;;  %s2889_s9 = inlined_call_operand.vmem [shape: f32[64,16], index: 9, kind: input, shape index: {}]   ;;  %s2890_s10 = inlined_call_operand.vmem [shape: f32[1,16], index: 10, kind: input, shape index: {}]   ;;  %s2891_s11 = inlined_call_operand.hbm [shape: f32[2,80], index: 11, kind: output, shape index: {0}]   ;;  %s2892_s12 = inlined_call_operand.hbm [shape: f32[2,64], index: 12, kind: output, shape index: {1}]   ;;  %s2893_s13 = inlined_call_operand.hbm [shape: f32[2,64], index: 13, kind: output, shape index: {2}]  }
   0x1   :  { %v43_v0 = vld [vmem:[%s2882_s2] sm:$0xff] }
   0x2   :  { %v80_v1 = vld [vmem:[%s2880_s0] sm:$0xff]  ;;  %104 = vmatpush.msra.mxu0 %v43_v0 }
   0x3   :  { %v44_v2 = vld [vmem:[%s2883_s3] sm:$0xff]  ;;  %1838 = vmatmul.msk.f32.vlgmr.msra.gmra.mxu0 %vm82_vm0, %v80_v1 }
   0x4   :  { %132 = vmatpush.msra.mxu1 %v44_v2 }
   0x5   :  { %133 = vmatmul.f32.vlgmr.msra.gmra.mxu1 %v2090_v3 }
   0x6   :  { %20 = vsyncpa [#allocation5], 0  ;;  %195 = vmatpush.msra.mxu2 %v44_v2  ;;  %265 = vmatpush.msra.mxu3 %v44_v2  ;;  %v2189_v4 = vld [vmem:[%s2884_s4] ss:$0 sm:$0xff]  ;;  %s2091_s3 = smov 112   ;;  %s2092_s4 = smov 8  }
   0x7   :  { %335 = vmatpush.msrb.mxu1 %v44_v2  ;;  %541 = vmatpush.msrb.mxu0 %v44_v2  ;;  %s2093_s15 = smov 16   ;;  %s2094_s16 = smov 104  }
   0x8   :  { %405 = vmatpush.msrb.mxu2 %v44_v2  ;;  %471 = vmatpush.msrb.mxu3 %v44_v2  ;;  %s2098_s29 = smov 24   ;;  %s2100_s30 = smov 40  }
   0x9   :  { %611 = vmatpush.msra.mxu1 %v44_v2  ;;  %s2101_s2 = smov 64   ;;  %s1809_s18 = sshll.u32 %s2892_s12, 4  ;;  %s1810_s18 = int_to_ptr.hbm [resolvable:$true] %s1809_s18 }
   0xa   :  { %s2104_s12 = smov [#allocation6]   ;;  %s1820_s22 = sshll.u32 %s2893_s13, 4  ;;  %s1821_s22 = int_to_ptr.hbm [resolvable:$true] %s1820_s22 }
   0xb   :  { %s1818_s19 = sshll.u32 %s2104_s12, 4  ;;  %s2105_s23 = smov [#allocation2]   ;;  %s1819_s19 = int_to_ptr.vmem [resolvable:$true] %s1818_s19 }
   0xc   :  { %s1796_s24 = sshll.u32 %s2105_s23, 4  ;;  %s1798_s25 = sshll.u32 %s2891_s11, 4  ;;  %s1797_s24 = int_to_ptr.vmem [resolvable:$true] %s1796_s24  ;;  %s1799_s25 = int_to_ptr.hbm [resolvable:$true] %s1798_s25 }
  0x80   :  { %v106_v5 = vpop.f32.mrf.mxu0 }
  0x81   :  { %v2192_v7 = vadd.f32 %v2189_v4, %v106_v5 }
  0x82   :  { %v134_v6 = vpop.f32.mrf.mxu1 }
  0x83   :  { %v137_v8 = vadd.f32 %v134_v6, %v2192_v7 }
  0x85   :  { %1891 = vtanh.f32 %v137_v8  ;;  %v138_v10 = vsub.f32 0.0, %v137_v8 }
  0x87   :  { %v139_v11 = vmul.f32 1.442695, %v138_v10 }
  0x89   :  { %1893 = vpow2.f32 %v139_v11 }
  0x8b   :  { %v1892_v9 = vpop.eup %1891 }
  0x8c   :  { %160 = vrot.lane.b32.xlu0 %v1892_v9, %s2091_s3 }
  0x8f   :  { %v1894_v12 = vpop.eup %1893 }
  0x90   :  { %v141_v13 = vadd.f32 1.0, %v1894_v12 }
  0x92   :  { %1895 = vrcp.f32 %v141_v13  ;;  %v153_v19 = vand.u32 2147483648, %v141_v13  ;;  %vm147_vm2 = vweird.f32 %v141_v13  ;;  %v151_v20 = vand.u32 2147483647, %v141_v13 }
  0x94   :  { %v154_v22 = vor.u32 1.1754944e-38, %v153_v19  ;;  %vm152_vm4 = vcmp.eq.f32.partialorder %v151_v20, 8.507059e+37 }
  0x98   :  { %v1896_v14 = vpop.eup %1895 }
  0x99   :  { %v143_v15 = vmul.f32 %v1896_v14, %v141_v13  ;;  %vm148_vm1 = vweird.f32 %v1896_v14 }
  0x9a   :  { %vm149_vm3 = vmor %vm147_vm2, %vm148_vm1 }
  0x9b   :  { %v144_v16 = vsub.f32 1.0, %v143_v15 }
  0x9d   :  { %v145_v17 = vmul.f32 %v1896_v14, %v144_v16 }
  0x9f   :  { %v146_v18 = vadd.f32 %v1896_v14, %v145_v17 }
  0xa1   :  { %v150_v21 = vsel %vm149_vm3, %v1896_v14, %v146_v18 }
  0xa2   :  { %v155_v24 = vsel %vm152_vm4, %v154_v22, %v150_v21 }
  0xa3   :  { %v158_v26 = vmul.f32 0.0, %v155_v24 }
  0xfe   :  { %v161_v23 = vpop.permute.xlu0 %160 }
  0xff   :  { %v163_v25 = vmul.f32 %v161_v23, %v155_v24 }
 0x101   :  { %165 = vrot.lane.b32.xlu0 %v163_v25, %s2092_s4 }
 0x173   :  { %v166_v27 = vpop.permute.xlu0 %165 }
 0x174   :  { %v168_v28 = vadd.f32 %v166_v27, %v158_v26 }
 0x176   :  { %1897 = vtanh.f32 %v168_v28  ;;  %v225_v53 = vrot.slane %v168_v28, 6 }
 0x17c   :  { %v1898_v29 = vpop.eup %1897 }
 0x17d   :  { %171 = vrot.lane.b32.xlu1 %v1898_v29, %s2093_s15 }
 0x1ef   :  { %v172_v30 = vpop.permute.xlu1 %171 }
 0x1f0   :  { %v2198_v31 = vmul.f32 %v172_v30, %v155_v24 }
 0x1f2   :  { %176 = vrot.lane.b32.xlu1 %v2198_v31, %s2094_s16 }
 0x264   :  { %v177_v32 = vpop.permute.xlu1 %176 }
 0x265   :  { %1840 = vmatmul.msk.f32.vlgmr.msra.gmra.mxu2 %vm82_vm0, %v177_v32 }
 0x2e8   :  { %v197_v33 = vpop.f32.mrf.mxu2 }
 0x2e9   :  { %v201_v34 = vrot.slane %v197_v33, 6 }
 0x2eb   :  { %v203_v35 = vadd.f32 %v201_v34, %v2192_v7 }
 0x2ed   :  { %1899 = vtanh.f32 %v203_v35  ;;  %v204_v37 = vsub.f32 0.0, %v203_v35 }
 0x2ef   :  { %v205_v38 = vmul.f32 1.442695, %v204_v37 }
 0x2f1   :  { %1901 = vpow2.f32 %v205_v38 }
 0x2f3   :  { %v1900_v36 = vpop.eup %1899 }
 0x2f4   :  { %229 = vrot.lane.b32.xlu2 %v1900_v36, %s2091_s3 }
 0x2f7   :  { %v1902_v39 = vpop.eup %1901 }
 0x2f8   :  { %v207_v40 = vadd.f32 1.0, %v1902_v39 }
 0x2fa   :  { %1903 = vrcp.f32 %v207_v40  ;;  %v219_v46 = vand.u32 2147483648, %v207_v40  ;;  %vm213_vm6 = vweird.f32 %v207_v40  ;;  %v217_v47 = vand.u32 2147483647, %v207_v40 }
 0x2fc   :  { %v220_v49 = vor.u32 1.1754944e-38, %v219_v46  ;;  %vm218_vm8 = vcmp.eq.f32.partialorder %v217_v47, 8.507059e+37 }
 0x300   :  { %v1904_v41 = vpop.eup %1903 }
 0x301   :  { %v209_v42 = vmul.f32 %v1904_v41, %v207_v40  ;;  %vm214_vm5 = vweird.f32 %v1904_v41 }
 0x302   :  { %vm215_vm7 = vmor %vm213_vm6, %vm214_vm5  ;;  %vm663_vm6 = vcmask 130048  }
 0x303   :  { %v210_v43 = vsub.f32 1.0, %v209_v42 }
 0x305   :  { %v211_v44 = vmul.f32 %v1904_v41, %v210_v43 }
 0x307   :  { %v212_v45 = vadd.f32 %v1904_v41, %v211_v44 }
 0x309   :  { %v216_v48 = vsel %vm215_vm7, %v1904_v41, %v212_v45  ;;  %vm665_vm7 = vcmask 195584  }
 0x30a   :  { %v221_v51 = vsel %vm218_vm8, %v220_v49, %v216_v48 }
 0x30b   :  { %v227_v54 = vmul.f32 %v225_v53, %v221_v51 }
 0x34e   :  { %v230_v50 = vpop.permute.xlu2 %229 }
 0x34f   :  { %v232_v52 = vmul.f32 %v230_v50, %v221_v51 }
 0x351   :  { %234 = vrot.lane.b32.xlu2 %v232_v52, %s2092_s4 }
 0x3ab   :  { %v235_v55 = vpop.permute.xlu2 %234 }
 0x3ac   :  { %v237_v56 = vadd.f32 %v235_v55, %v227_v54 }
 0x3ae   :  { %1905 = vtanh.f32 %v237_v56  ;;  %v295_v20 = vrot.slane %v237_v56, 6 }
 0x3b4   :  { %v1906_v57 = vpop.eup %1905 }
 0x3b5   :  { %240 = vrot.lane.b32.xlu0 %v1906_v57, %s2093_s15  ;;  %v81_v57 = vld [vmem:[%s2880_s0 + $0x8] sm:$0xff]  ;;  %s2095_s0 = smov 120  }
 0x3b6   :  { %1839 = vmatmul.msk.f32.gmra.mxu0 %vm82_vm0, %v81_v57 }
 0x427   :  { %v241_v58 = vpop.permute.xlu0 %240 }
 0x428   :  { %v2207_v59 = vmul.f32 %v241_v58, %v221_v51 }
 0x42a   :  { %v245_v60 = vrot.slane %v2207_v59, 2 }
 0x42c   :  { %246 = vrot.lane.b32.xlu1 %v245_v60, %s2094_s16 }
 0x49e   :  { %v247_v61 = vpop.permute.xlu1 %246 }
 0x49f   :  { %1841 = vmatmul.msk.f32.vlgmr.msra.gmra.mxu3 %vm82_vm0, %v247_v61  ;;  %v109_v61 = vpop.f32.mrf.mxu0 }
 0x522   :  { %v267_v62 = vpop.f32.mrf.mxu3 }
 0x523   :  { %v271_v63 = vrot.slane %v267_v62, 4  ;;  %v2241_v62 = vadd.f32 %v2189_v4, %v109_v61 }
 0x525   :  { %v273_v0 = vadd.f32 %v271_v63, %v2192_v7 }
 0x527   :  { %1907 = vtanh.f32 %v273_v0  ;;  %v274_v2 = vsub.f32 0.0, %v273_v0 }
 0x529   :  { %v275_v3 = vmul.f32 1.442695, %v274_v2 }
 0x52b   :  { %1909 = vpow2.f32 %v275_v3 }
 0x52d   :  { %v1908_v1 = vpop.eup %1907 }
 0x52e   :  { %299 = vrot.lane.b32.xlu2 %v1908_v1, %s2091_s3 }
 0x531   :  { %v1910_v5 = vpop.eup %1909 }
 0x532   :  { %v277_v6 = vadd.f32 1.0, %v1910_v5 }
 0x534   :  { %1911 = vrcp.f32 %v277_v6  ;;  %v289_v13 = vand.u32 2147483648, %v277_v6  ;;  %vm283_vm10 = vweird.f32 %v277_v6  ;;  %v287_v14 = vand.u32 2147483647, %v277_v6 }
 0x536   :  { %v290_v16 = vor.u32 1.1754944e-38, %v289_v13  ;;  %vm288_vm12 = vcmp.eq.f32.partialorder %v287_v14, 8.507059e+37 }
 0x53a   :  { %v1912_v8 = vpop.eup %1911 }
 0x53b   :  { %v279_v9 = vmul.f32 %v1912_v8, %v277_v6  ;;  %vm284_vm9 = vweird.f32 %v1912_v8 }
 0x53c   :  { %vm285_vm11 = vmor %vm283_vm10, %vm284_vm9  ;;  %vm692_vm9 = vcmask 523264  }
 0x53d   :  { %v280_v10 = vsub.f32 1.0, %v279_v9 }
 0x53f   :  { %v281_v11 = vmul.f32 %v1912_v8, %v280_v10 }
 0x541   :  { %v282_v12 = vadd.f32 %v1912_v8, %v281_v11 }
 0x543   :  { %v286_v15 = vsel %vm285_vm11, %v1912_v8, %v282_v12 }
 0x544   :  { %v291_v18 = vsel %vm288_vm12, %v290_v16, %v286_v15 }
 0x545   :  { %v297_v21 = vmul.f32 %v295_v20, %v291_v18  ;;  %v2256_v20 = vld [vmem:[%s2885_s5 + $0x8] sm:$0xff] }
 0x588   :  { %v300_v17 = vpop.permute.xlu2 %299 }
 0x589   :  { %v302_v19 = vmul.f32 %v300_v17, %v291_v18 }
 0x58b   :  { %304 = vrot.lane.b32.xlu0 %v302_v19, %s2092_s4  ;;  %v2251_v19 = vld [vmem:[%s2885_s5 + $0x10] sm:$0xff] }
 0x58c   :  { %682 = vmatpush.msra.mxu2 %v2251_v19 }
 0x58e   :  { %683 = vmatpush.msra.mxu2 %v2256_v20 }
 0x5fd   :  { %v305_v22 = vpop.permute.xlu0 %304 }
 0x5fe   :  { %v307_v23 = vadd.f32 %v305_v22, %v297_v21 }
 0x600   :  { %1913 = vtanh.f32 %v307_v23  ;;  %v365_v49 = vrot.slane %v307_v23, 6 }
 0x606   :  { %v1914_v24 = vpop.eup %1913 }
 0x607   :  { %310 = vrot.lane.b32.xlu1 %v1914_v24, %s2093_s15 }
 0x679   :  { %v311_v25 = vpop.permute.xlu1 %310 }
 0x67a   :  { %v2218_v26 = vmul.f32 %v311_v25, %v291_v18 }
 0x67c   :  { %v315_v27 = vrot.slane %v2218_v26, 4 }
 0x67e   :  { %316 = vrot.lane.b32.xlu2 %v315_v27, %s2094_s16 }
 0x6d8   :  { %v317_v28 = vpop.permute.xlu2 %316 }
 0x6d9   :  { %1842 = vmatmul.msk.f32.vlgmr.msrb.gmra.mxu1 %vm82_vm0, %v317_v28 }
 0x6da   :  { %809 = vmatpush.msrb.mxu1 %v2251_v19 }
 0x6dc   :  { %810 = vmatpush.msrb.mxu1 %v2256_v20 }
 0x756   :  { %v337_v29 = vpop.f32.mrf.mxu1 }
 0x757   :  { %v341_v30 = vrot.slane %v337_v29, 2 }
 0x759   :  { %v343_v32 = vadd.f32 %v341_v30, %v2192_v7  ;;  %v2278_v30 = vld [vmem:[%s2887_s7 + $0x38] sm:$0xff] }
 0x75a   :  { %704 = vmatpush.msra.mxu3 %v2278_v30 }
 0x75b   :  { %1915 = vtanh.f32 %v343_v32  ;;  %v344_v34 = vsub.f32 0.0, %v343_v32  ;;  %v2283_v32 = vld [vmem:[%s2887_s7 + $0x30] sm:$0xff] }
 0x75c   :  { %705 = vmatpush.msra.mxu3 %v2283_v32 }
 0x75d   :  { %v345_v35 = vmul.f32 1.442695, %v344_v34  ;;  %v2297_v34 = vld [vmem:[%s2887_s7 + $0x20] sm:$0xff] }
 0x75f   :  { %1917 = vpow2.f32 %v345_v35 }
 0x761   :  { %v1916_v33 = vpop.eup %1915 }
 0x762   :  { %369 = vrot.lane.b32.xlu0 %v1916_v33, %s2091_s3  ;;  %v2290_v33 = vld [vmem:[%s2887_s7 + $0x28] sm:$0xff] }
 0x763   :  { %706 = vmatpush.msra.mxu3 %v2290_v33 }
 0x765   :  { %v1918_v36 = vpop.eup %1917  ;;  %707 = vmatpush.msra.mxu3 %v2297_v34 }
 0x766   :  { %v347_v37 = vadd.f32 1.0, %v1918_v36 }
 0x768   :  { %1919 = vrcp.f32 %v347_v37  ;;  %v359_v43 = vand.u32 2147483648, %v347_v37  ;;  %vm353_vm14 = vweird.f32 %v347_v37  ;;  %v357_v44 = vand.u32 2147483647, %v347_v37 }
 0x76a   :  { %v360_v45 = vor.u32 1.1754944e-38, %v359_v43  ;;  %vm358_vm1 = vcmp.eq.f32.partialorder %v357_v44, 8.507059e+37 }
 0x76e   :  { %v1920_v38 = vpop.eup %1919 }
 0x76f   :  { %v349_v39 = vmul.f32 %v1920_v38, %v347_v37  ;;  %vm354_vm13 = vweird.f32 %v1920_v38  ;;  %v2310_v37 = vld [vmem:[%s2887_s7 + $0x18] sm:$0xff] }
 0x770   :  { %vm355_vm15 = vmor %vm353_vm14, %vm354_vm13  ;;  %708 = vmatpush.msra.mxu3 %v2310_v37 }
 0x771   :  { %v350_v40 = vsub.f32 1.0, %v349_v39  ;;  %v2322_v39 = vld [vmem:[%s2887_s7 + $0x8] sm:$0xff] }
 0x773   :  { %v351_v41 = vmul.f32 %v1920_v38, %v350_v40  ;;  %v2329_v40 = vld [vmem:[%s2887_s7] sm:$0xff] }
 0x775   :  { %v352_v42 = vadd.f32 %v1920_v38, %v351_v41  ;;  %v2338_v41 = vld [vmem:[%s2886_s6] ss:$0 sm:$0xff] }
 0x777   :  { %v356_v7 = vsel %vm355_vm15, %v1920_v38, %v352_v42  ;;  %v2315_v38 = vld [vmem:[%s2887_s7 + $0x10] sm:$0xff]  ;;  %vm745_vm15 = vcmask 123968  }
 0x778   :  { %v361_v47 = vsel %vm358_vm1, %v360_v45, %v356_v7  ;;  %709 = vmatpush.msra.mxu3 %v2315_v38 }
 0x779   :  { %v367_v50 = vmul.f32 %v365_v49, %v361_v47 }
 0x77a   :  { %710 = vmatpush.msra.mxu3 %v2322_v39 }
 0x77c   :  { %711 = vmatpush.msra.mxu3 %v2329_v40 }
 0x7d4   :  { %v370_v46 = vpop.permute.xlu0 %369 }
 0x7d5   :  { %v372_v48 = vmul.f32 %v370_v46, %v361_v47 }
 0x7d7   :  { %374 = vrot.lane.b32.xlu1 %v372_v48, %s2092_s4 }
 0x849   :  { %v375_v51 = vpop.permute.xlu1 %374 }
 0x84a   :  { %v377_v52 = vadd.f32 %v375_v51, %v367_v50 }
 0x84c   :  { %1921 = vtanh.f32 %v377_v52  ;;  %v432_v21 = vrot.slane %v377_v52, 6 }
 0x852   :  { %v1922_v53 = vpop.eup %1921 }
 0x853   :  { %380 = vrot.lane.b32.xlu2 %v1922_v53, %s2093_s15 }
 0x8ad   :  { %v381_v54 = vpop.permute.xlu2 %380 }
 0x8ae   :  { %v2229_v55 = vmul.f32 %v381_v54, %v361_v47 }
 0x8b0   :  { %v385_v56 = vrot.slane %v2229_v55, 6 }
 0x8b2   :  { %386 = vrot.lane.b32.xlu0 %v385_v56, %s2094_s16 }
 0x924   :  { %v387_v58 = vpop.permute.xlu0 %386 }
 0x925   :  { %1843 = vmatmul.msk.f32.vlgmr.msrb.gmra.mxu2 %vm82_vm0, %v387_v58 }
 0x9a8   :  { %v407_v63 = vpop.f32.mrf.mxu2 }
 0x9a9   :  { %v410_v0 = vadd.f32 %v407_v63, %v2241_v62 }
 0x9ab   :  { %1923 = vtanh.f32 %v410_v0  ;;  %v411_v2 = vsub.f32 0.0, %v410_v0 }
 0x9ad   :  { %v412_v3 = vmul.f32 1.442695, %v411_v2 }
 0x9af   :  { %1925 = vpow2.f32 %v412_v3 }
 0x9b1   :  { %v1924_v1 = vpop.eup %1923 }
 0x9b2   :  { %436 = vrot.lane.b32.xlu1 %v1924_v1, %s2091_s3 }
 0x9b5   :  { %v1926_v5 = vpop.eup %1925 }
 0x9b6   :  { %v414_v6 = vadd.f32 1.0, %v1926_v5 }
 0x9b8   :  { %1927 = vrcp.f32 %v414_v6  ;;  %v426_v4 = vand.u32 2147483648, %v414_v6  ;;  %vm420_vm3 = vweird.f32 %v414_v6  ;;  %v424_v13 = vand.u32 2147483647, %v414_v6 }
 0x9ba   :  { %v427_v15 = vor.u32 1.1754944e-38, %v426_v4  ;;  %vm425_vm5 = vcmp.eq.f32.partialorder %v424_v13, 8.507059e+37  ;;  %v2360_v13 = vld [vmem:[%s2889_s9 + $0x38] sm:$0xff] }
 0x9bb   :  { %730 = vmatpush.msra.mxu0 %v2360_v13 }
 0x9be   :  { %v1928_v8 = vpop.eup %1927 }
 0x9bf   :  { %v416_v9 = vmul.f32 %v1928_v8, %v414_v6  ;;  %vm421_vm2 = vweird.f32 %v1928_v8 }
 0x9c0   :  { %vm422_vm4 = vmor %vm420_vm3, %vm421_vm2 }
 0x9c1   :  { %v417_v10 = vsub.f32 1.0, %v416_v9 }
 0x9c3   :  { %v418_v11 = vmul.f32 %v1928_v8, %v417_v10 }
 0x9c5   :  { %v419_v12 = vadd.f32 %v1928_v8, %v418_v11 }
 0x9c7   :  { %v423_v14 = vsel %vm422_vm4, %v1928_v8, %v419_v12 }
 0x9c8   :  { %v428_v17 = vsel %vm425_vm5, %v427_v15, %v423_v14  ;;  %v2365_v14 = vld [vmem:[%s2889_s9 + $0x30] sm:$0xff]  ;;  %v2372_v15 = vld [vmem:[%s2889_s9 + $0x28] sm:$0xff]  ;;  %vm756_vm5 = vcmask 58368  }
 0x9c9   :  { %v434_v22 = vmul.f32 %v432_v21, %v428_v17  ;;  %731 = vmatpush.msra.mxu0 %v2365_v14 }
 0x9cb   :  { %732 = vmatpush.msra.mxu0 %v2372_v15 }
 0xa24   :  { %v437_v16 = vpop.permute.xlu1 %436 }
 0xa25   :  { %v439_v18 = vmul.f32 %v437_v16, %v428_v17  ;;  %v2379_v16 = vld [vmem:[%s2889_s9 + $0x20] sm:$0xff] }
 0xa26   :  { %733 = vmatpush.msra.mxu0 %v2379_v16 }
 0xa27   :  { %441 = vrot.lane.b32.xlu2 %v439_v18, %s2092_s4 }
 0xa2f   :  { %660 = vrot.lane.b32.xlu2 %v2198_v31, %s2095_s0  ;;  %v2265_v31 = vld [vmem:[%s2885_s5] sm:$0xff] }
 0xa30   :  { %684 = vmatpush.msra.mxu2 %v2265_v31  ;;  %811 = vmatpush.msrb.mxu1 %v2265_v31 }
 0xa32   :  { %830 = vmatpush.msrb.mxu2 %v2278_v30 }
 0xa34   :  { %831 = vmatpush.msrb.mxu2 %v2283_v32 }
 0xa36   :  { %832 = vmatpush.msrb.mxu2 %v2290_v33 }
 0xa38   :  { %833 = vmatpush.msrb.mxu2 %v2297_v34 }
 0xa3a   :  { %834 = vmatpush.msrb.mxu2 %v2310_v37 }
 0xa3c   :  { %835 = vmatpush.msrb.mxu2 %v2315_v38 }
 0xa3e   :  { %836 = vmatpush.msrb.mxu2 %v2322_v39 }
 0xa40   :  { %837 = vmatpush.msrb.mxu2 %v2329_v40 }
 0xa81   :  { %v442_v23 = vpop.permute.xlu2 %441 }
 0xa82   :  { %v2269_v24 = vadd.f32 %v442_v23, %v434_v22  ;;  %v2394_v22 = vld [vmem:[%s2889_s9 + $0x18] sm:$0xff]  ;;  %v2399_v23 = vld [vmem:[%s2889_s9 + $0x10] sm:$0xff] }
 0xa83   :  { %734 = vmatpush.msra.mxu0 %v2394_v22 }
 0xa84   :  { %1929 = vtanh.f32 %v2269_v24  ;;  %v501_v9 = vrot.slane %v2269_v24, 6  ;;  %v2406_v24 = vld [vmem:[%s2889_s9 + $0x8] sm:$0xff] }
 0xa85   :  { %735 = vmatpush.msra.mxu0 %v2399_v23 }
 0xa87   :  { %736 = vmatpush.msra.mxu0 %v2406_v24 }
 0xa89   :  { %v661_v25 = vpop.permute.xlu2 %660 }
 0xa8a   :  { %v1930_v28 = vpop.eup %1929  ;;  %v664_v29 = vsel %vm663_vm6, 0.0, %v661_v25  ;;  %v2413_v25 = vld [vmem:[%s2889_s9] sm:$0xff] }
 0xa8b   :  { %1847 = vmatmul.msk.f32.vlgmr.msra.gmra.mxu2 %vm665_vm7, %v664_v29  ;;  %447 = vrot.lane.b32.xlu0 %v1930_v28, %s2093_s15  ;;  %v2422_v28 = vld [vmem:[%s2888_s8] ss:$0 sm:$0xff] }
 0xa8c   :  { %984 = vmatpush.msra.mxu2 %v2360_v13  ;;  %737 = vmatpush.msra.mxu0 %v2413_v25 }
 0xa8e   :  { %985 = vmatpush.msra.mxu2 %v2365_v14 }
 0xa90   :  { %986 = vmatpush.msra.mxu2 %v2372_v15 }
 0xa92   :  { %987 = vmatpush.msra.mxu2 %v2379_v16 }
 0xa94   :  { %988 = vmatpush.msra.mxu2 %v2394_v22 }
 0xa96   :  { %989 = vmatpush.msra.mxu2 %v2399_v23 }
 0xa98   :  { %990 = vmatpush.msra.mxu2 %v2406_v24 }
 0xa9a   :  { %991 = vmatpush.msra.mxu2 %v2413_v25 }
 0xafd   :  { %v448_v35 = vpop.permute.xlu0 %447 }
 0xafe   :  { %v2303_v36 = vmul.f32 %v448_v35, %v428_v17 }
 0xb00   :  { %452 = vrot.lane.b32.xlu1 %v2303_v36, %s2094_s16 }
 0xb0e   :  { %v686_v42 = vpop.f32.mrf.mxu2 }
 0xb0f   :  { %v687_v43 = vadd.f32 %v2338_v41, %v686_v42 }
 0xb11   :  { %v690_v7 = vmul.f32 0.2, %v687_v43  ;;  %vm689_vm8 = vcmp.gt.f32.partialorder %v687_v43, 0.0 }
 0xb13   :  { %v691_v45 = vsel %vm689_vm8, %v687_v43, %v690_v7 }
 0xb72   :  { %v453_v44 = vpop.permute.xlu1 %452 }
 0xb73   :  { %1844 = vmatmul.msk.f32.vlgmr.msrb.gmra.mxu3 %vm82_vm0, %v453_v44 }
 0xb74   :  { %937 = vmatpush.msrb.mxu3 %v2251_v19 }
 0xb76   :  { %938 = vmatpush.msrb.mxu3 %v2256_v20 }
 0xb78   :  { %939 = vmatpush.msrb.mxu3 %v2265_v31 }
 0xb7b   :  { %1848 = vmatmul.msk.f32.vlgmr.msra.gmra.mxu3 %vm692_vm9, %v691_v45 }
 0xb7c   :  { %1065 = vmatpush.msra.mxu3 %v2251_v19 }
 0xb7e   :  { %1066 = vmatpush.msra.mxu3 %v2256_v20 }
 0xb80   :  { %1067 = vmatpush.msra.mxu3 %v2265_v31 }
 0xbf6   :  { %v473_v46 = vpop.f32.mrf.mxu3 }
 0xbf7   :  { %v477_v47 = vrot.slane %v473_v46, 6 }
 0xbf9   :  { %v479_v48 = vadd.f32 %v477_v47, %v2241_v62  ;;  %v2442_v47 = vld [vmem:[%s2890_s10] ss:$0 sm:$0xff] }
 0xbfb   :  { %1931 = vtanh.f32 %v479_v48  ;;  %v480_v50 = vsub.f32 0.0, %v479_v48 }
 0xbfd   :  { %v481_v51 = vmul.f32 1.442695, %v480_v50 }
 0xbfe   :  { %v713_v29 = vpop.f32.mrf.mxu3 }
 0xbff   :  { %1933 = vpow2.f32 %v481_v51  ;;  %v714_v35 = vadd.f32 %v2422_v28, %v713_v29 }
 0xc01   :  { %v1932_v49 = vpop.eup %1931  ;;  %v717_v43 = vmul.f32 0.2, %v714_v35  ;;  %vm716_vm14 = vcmp.gt.f32.partialorder %v714_v35, 0.0 }
 0xc02   :  { %505 = vrot.lane.b32.xlu0 %v1932_v49, %s2091_s3 }
 0xc03   :  { %v718_v44 = vsel %vm716_vm14, %v714_v35, %v717_v43 }
 0xc05   :  { %v1934_v52 = vpop.eup %1933 }
 0xc06   :  { %v483_v53 = vadd.f32 1.0, %v1934_v52 }
 0xc08   :  { %1935 = vrcp.f32 %v483_v53  ;;  %v495_v0 = vand.u32 2147483648, %v483_v53  ;;  %vm489_vm11 = vweird.f32 %v483_v53  ;;  %v493_v1 = vand.u32 2147483647, %v483_v53 }
 0xc0a   :  { %v496_v3 = vor.u32 1.1754944e-38, %v495_v0  ;;  %vm494_vm13 = vcmp.eq.f32.partialorder %v493_v1, 8.507059e+37 }
 0xc0e   :  { %v1936_v54 = vpop.eup %1935 }
 0xc0f   :  { %v485_v57 = vmul.f32 %v1936_v54, %v483_v53  ;;  %vm490_vm10 = vweird.f32 %v1936_v54 }
 0xc10   :  { %vm491_vm12 = vmor %vm489_vm11, %vm490_vm10 }
 0xc11   :  { %v486_v58 = vsub.f32 1.0, %v485_v57 }
 0xc13   :  { %v487_v61 = vmul.f32 %v1936_v54, %v486_v58 }
 0xc15   :  { %v488_v63 = vadd.f32 %v1936_v54, %v487_v61 }
 0xc17   :  { %v492_v2 = vsel %vm491_vm12, %v1936_v54, %v488_v63 }
 0xc18   :  { %v497_v6 = vsel %vm494_vm13, %v496_v3, %v492_v2 }
 0xc19   :  { %v503_v10 = vmul.f32 %v501_v9, %v497_v6 }
 0xc74   :  { %v506_v5 = vpop.permute.xlu0 %505 }
 0xc75   :  { %v508_v8 = vmul.f32 %v506_v5, %v497_v6 }
 0xc77   :  { %510 = vrot.lane.b32.xlu1 %v508_v8, %s2092_s4 }
 0xce9   :  { %v511_v11 = vpop.permute.xlu1 %510 }
 0xcea   :  { %v2353_v12 = vadd.f32 %v511_v11, %v503_v10 }
 0xcec   :  { %1937 = vtanh.f32 %v2353_v12  ;;  %v571_v43 = vrot.slane %v2353_v12, 6 }
 0xcf2   :  { %v1938_v4 = vpop.eup %1937 }
 0xcf3   :  { %516 = vrot.lane.b32.xlu2 %v1938_v4, %s2093_s15 }
 0xd4d   :  { %v517_v17 = vpop.permute.xlu2 %516 }
 0xd4e   :  { %v2385_v18 = vmul.f32 %v517_v17, %v497_v6 }
 0xd50   :  { %v521_v21 = vrot.slane %v2385_v18, 2 }
 0xd52   :  { %522 = vrot.lane.b32.xlu0 %v521_v21, %s2094_s16 }
 0xdc4   :  { %v523_v42 = vpop.permute.xlu0 %522 }
 0xdc5   :  { %1845 = vmatmul.msk.f32.vlgmr.msrb.gmra.mxu0 %vm82_vm0, %v523_v42 }
 0xdc6   :  { %958 = vmatpush.msrb.mxu0 %v2278_v30 }
 0xdc8   :  { %959 = vmatpush.msrb.mxu0 %v2283_v32 }
 0xdca   :  { %960 = vmatpush.msrb.mxu0 %v2290_v33 }
 0xdcc   :  { %961 = vmatpush.msrb.mxu0 %v2297_v34 }
 0xdcd   :  { %1849 = vmatmul.msk.f32.vlgmr.msra.gmra.mxu0 %vm692_vm9, %v718_v44 }
 0xdce   :  { %962 = vmatpush.msrb.mxu0 %v2310_v37 }
 0xdd0   :  { %963 = vmatpush.msrb.mxu0 %v2315_v38 }
 0xdd2   :  { %964 = vmatpush.msrb.mxu0 %v2322_v39 }
 0xdd4   :  { %965 = vmatpush.msrb.mxu0 %v2329_v40 }
 0xdd6   :  { %1193 = vmatpush.msra.mxu0 %v2251_v19 }
 0xdd8   :  { %1194 = vmatpush.msra.mxu0 %v2256_v20 }
 0xdda   :  { %1195 = vmatpush.msra.mxu0 %v2265_v31 }
 0xe42   :  { %v543_v7 = vpop.f32.mrf.mxu0 }
 0xe43   :  { %v547_v45 = vrot.slane %v543_v7, 4 }
 0xe45   :  { %v549_v46 = vadd.f32 %v547_v45, %v2241_v62 }
 0xe47   :  { %1939 = vtanh.f32 %v549_v46  ;;  %v550_v52 = vsub.f32 0.0, %v549_v46 }
 0xe49   :  { %v551_v53 = vmul.f32 1.442695, %v550_v52 }
 0xe4a   :  { %v739_v48 = vpop.f32.mrf.mxu0 }
 0xe4b   :  { %v2445_v49 = vadd.f32 %v2442_v47, %v739_v48  ;;  %1941 = vpow2.f32 %v551_v53 }
 0xe4d   :  { %v1940_v50 = vpop.eup %1939  ;;  %v746_v51 = vsel %vm745_vm15, %v2445_v49, -inf  ;;  %vm742_vm13 = vcmp.gt.f32.partialorder %v2445_v49, 0.0 }
 0xe4e   :  { %747 = vmax.xlane.f32.xlu1 %v746_v51  ;;  %575 = vrot.lane.b32.xlu0 %v1940_v50, %s2091_s3 }
 0xe51   :  { %v1942_v54 = vpop.eup %1941 }
 0xe52   :  { %v553_v57 = vadd.f32 1.0, %v1942_v54 }
 0xe54   :  { %1943 = vrcp.f32 %v553_v57  ;;  %v565_v2 = vand.u32 2147483648, %v553_v57  ;;  %vm559_vm2 = vweird.f32 %v553_v57  ;;  %v563_v3 = vand.u32 2147483647, %v553_v57 }
 0xe56   :  { %v566_v6 = vor.u32 1.1754944e-38, %v565_v2  ;;  %vm564_vm4 = vcmp.eq.f32.partialorder %v563_v3, 8.507059e+37 }
 0xe5a   :  { %v1944_v58 = vpop.eup %1943 }
 0xe5b   :  { %v555_v61 = vmul.f32 %v1944_v58, %v553_v57  ;;  %vm560_vm1 = vweird.f32 %v1944_v58 }
 0xe5c   :  { %vm561_vm3 = vmor %vm559_vm2, %vm560_vm1 }
 0xe5d   :  { %v556_v63 = vsub.f32 1.0, %v555_v61 }
 0xe5f   :  { %v557_v0 = vmul.f32 %v1944_v58, %v556_v63 }
 0xe61   :  { %v558_v1 = vadd.f32 %v1944_v58, %v557_v0 }
 0xe63   :  { %v562_v5 = vsel %vm561_vm3, %v1944_v58, %v558_v1 }
 0xe64   :  { %v567_v9 = vsel %vm564_vm4, %v566_v6, %v562_v5 }
 0xe65   :  { %v573_v44 = vmul.f32 %v571_v43, %v567_v9 }
 0xec0   :  { %v576_v8 = vpop.permute.xlu0 %575 }
 0xec1   :  { %v578_v10 = vmul.f32 %v576_v8, %v567_v9  ;;  %v748_v11 = vpop.xlane.xlu1 %747 }
 0xec2   :  { %v749_v4 = vsub.f32 %v2445_v49, %v748_v11  ;;  %v743_v11 = vmul.f32 0.2, %v2445_v49 }
 0xec3   :  { %580 = vrot.lane.b32.xlu0 %v578_v10, %s2092_s4  ;;  %v2475_v10 = vld [vmem:[%s2881_s1] sm:$0xff] }
 0xec4   :  { %v750_v17 = vmul.f32 1.442695, %v749_v4 }
 0xec6   :  { %1945 = vpow2.f32 %v750_v17  ;;  %v2481_v17 = vsel %vm742_vm13, %v2445_v49, %v743_v11 }
 0xecc   :  { %v1946_v29 = vpop.eup %1945 }
 0xecd   :  { %753 = vrot.lane.b32.xlu2 %v1946_v29, %s2095_s0 }
 0xf27   :  { %v754_v35 = vpop.permute.xlu2 %753 }
 0xf28   :  { %v757_v42 = vsel %vm756_vm5, %v754_v35, 0.0 }
 0xf29   :  { %758 = vadd.xlane.f32.xlu2 %v757_v42 }
 0xf35   :  { %v581_v7 = vpop.permute.xlu0 %580 }
 0xf36   :  { %v2455_v45 = vadd.f32 %v581_v7, %v573_v44 }
 0xf38   :  { %1947 = vtanh.f32 %v2455_v45 }
 0xf3e   :  { %v1948_v46 = vpop.eup %1947 }
 0xf3f   :  { %586 = vrot.lane.b32.xlu0 %v1948_v46, %s2093_s15 }
 0xf9c   :  { %v759_v48 = vpop.xlane.xlu2 %758 }
 0xf9d   :  { %1949 = vrcp.f32 %v759_v48  ;;  %v771_v53 = vand.u32 2147483648, %v759_v48  ;;  %v769_v57 = vand.u32 2147483647, %v759_v48  ;;  %vm765_vm10 = vweird.f32 %v759_v48 }
 0xf9f   :  { %v772_v12 = vor.u32 1.1754944e-38, %v771_v53  ;;  %vm770_vm12 = vcmp.eq.f32.partialorder %v769_v57, 8.507059e+37 }
 0xfa3   :  { %v1950_v50 = vpop.eup %1949 }
 0xfa4   :  { %v761_v51 = vmul.f32 %v1950_v50, %v759_v48  ;;  %vm766_vm8 = vweird.f32 %v1950_v50 }
 0xfa5   :  { %vm767_vm11 = vmor %vm765_vm10, %vm766_vm8 }
 0xfa6   :  { %v762_v52 = vsub.f32 1.0, %v761_v51 }
 0xfa8   :  { %v763_v54 = vmul.f32 %v1950_v50, %v762_v52 }
 0xfaa   :  { %v764_v58 = vadd.f32 %v1950_v50, %v763_v54 }
 0xfac   :  { %v768_v61 = vsel %vm767_vm11, %v1950_v50, %v764_v58 }
 0xfad   :  { %v773_v63 = vsel %vm770_vm12, %v772_v12, %v768_v61 }
 0xfae   :  { %v2459_v0 = vmul.f32 %v1946_v29, %v773_v63 }
 0xfb0   :  { %v775_v1 = vmul.f32 0.5, %v2459_v0 }
 0xfb1   :  { %v587_v5 = vpop.permute.xlu0 %586 }
 0xfb2   :  { %v776_v2 = vmul.f32 1.442695, %v775_v1  ;;  %v2463_v6 = vmul.f32 %v587_v5, %v567_v9 }
 0xfb4   :  { %1951 = vpow2.f32 %v776_v2  ;;  %v591_v8 = vrot.slane %v2463_v6, 4 }
 0xfba   :  { %v1952_v3 = vpop.eup %1951 }
 0xfbb   :  { %779 = vrot.lane.b32.xlu0 %v1952_v3, %s2095_s0 }
 0xfc3   :  { %592 = vrot.lane.b32.xlu0 %v591_v8, %s2094_s16 }
 0xfcb   :  { %788 = vrot.lane.b32.xlu0 %v245_v60, %s2095_s0 }
0x102d   :  { %v780_v9 = vpop.permute.xlu0 %779 }
0x102e   :  { %v782_v4 = vmul.f32 %v780_v9, %v2475_v10 }
0x1030   :  { %v2484_v29 = vadd.f32 %v782_v4, %v2481_v17 }
0x1032   :  { %785 = vrot.lane.b32.xlu1 %v2484_v29, %s2092_s4 }
0x1035   :  { %v593_v59 = vpop.permute.xlu0 %592 }
0x1036   :  { %1846 = vmatmul.msk.f32.vlgmr.msra.gmra.mxu1 %vm82_vm0, %v593_v59 }
0x1037   :  { %856 = vmatpush.msra.mxu1 %v2360_v13 }
0x1039   :  { %857 = vmatpush.msra.mxu1 %v2365_v14 }
0x103a   :  { %916 = vrot.lane.b32.xlu1 %v315_v27, %s2095_s0 }
0x103b   :  { %858 = vmatpush.msra.mxu1 %v2372_v15 }
0x103d   :  { %859 = vmatpush.msra.mxu1 %v2379_v16  ;;  %v789_v49 = vpop.permute.xlu0 %788 }
0x103f   :  { %860 = vmatpush.msra.mxu1 %v2394_v22 }
0x1041   :  { %861 = vmatpush.msra.mxu1 %v2399_v23 }
0x1043   :  { %862 = vmatpush.msra.mxu1 %v2406_v24 }
0x1045   :  { %863 = vmatpush.msra.mxu1 %v2413_v25 }
0x10a4   :  { %v786_v60 = vpop.permute.xlu1 %785 }
0x10a5   :  { %v791_v35 = vsel %vm82_vm0, 0.0, %v786_v60 }
0x10a6   :  { %v792_v42 = vsel %vm663_vm6, %v791_v35, %v789_v49 }
0x10a7   :  { %1850 = vmatmul.msk.f32.vlgmr.msrb.gmra.mxu1 %vm665_vm7, %v792_v42 }
0x10a8   :  { %1086 = vmatpush.msrb.mxu1 %v2278_v30 }
0x10aa   :  { %1087 = vmatpush.msrb.mxu1 %v2283_v32 }
0x10ac   :  { %1088 = vmatpush.msrb.mxu1 %v2290_v33 }
0x10ae   :  { %1089 = vmatpush.msrb.mxu1 %v2297_v34 }
0x10b0   :  { %1090 = vmatpush.msrb.mxu1 %v2310_v37 }
0x10b2   :  { %1091 = vmatpush.msrb.mxu1 %v2315_v38 }
0x10b3   :  { %v2511_v26 = vpop.f32.mrf.mxu1 }
0x10b4   :  { %1092 = vmatpush.msrb.mxu1 %v2322_v39 }
0x10b6   :  { %1093 = vmatpush.msrb.mxu1 %v2329_v40 }
0x1124   :  { %v813_v27 = vpop.f32.mrf.mxu1 }
0x1125   :  { %v814_v43 = vadd.f32 %v2338_v41, %v813_v27 }
0x1127   :  { %vm816_vm14 = vcmp.gt.f32.partialorder %v814_v43, 0.0  ;;  %v817_v44 = vmul.f32 0.2, %v814_v43 }
0x1129   :  { %v818_v7 = vsel %vm816_vm14, %v814_v43, %v817_v44 }
0x112a   :  { %1851 = vmatmul.msk.f32.vlgmr.msrb.gmra.mxu2 %vm692_vm9, %v818_v7 }
0x112b   :  { %1214 = vmatpush.msrb.mxu2 %v2278_v30 }
0x112d   :  { %1215 = vmatpush.msrb.mxu2 %v2283_v32 }
0x112f   :  { %1216 = vmatpush.msrb.mxu2 %v2290_v33 }
0x1131   :  { %1217 = vmatpush.msrb.mxu2 %v2297_v34 }
0x1133   :  { %1218 = vmatpush.msrb.mxu2 %v2310_v37 }
0x1135   :  { %1219 = vmatpush.msrb.mxu2 %v2315_v38 }
0x1137   :  { %1220 = vmatpush.msrb.mxu2 %v2322_v39 }
0x1139   :  { %1221 = vmatpush.msrb.mxu2 %v2329_v40 }
0x11ad   :  { %v839_v46 = vpop.f32.mrf.mxu2 }
0x11ae   :  { %v840_v48 = vadd.f32 %v2422_v28, %v839_v46 }
0x11b0   :  { %vm842_vm1 = vcmp.gt.f32.partialorder %v840_v48, 0.0  ;;  %v843_v50 = vmul.f32 0.2, %v840_v48 }
0x11b2   :  { %v844_v51 = vsel %vm842_vm1, %v840_v48, %v843_v50 }
0x11b3   :  { %1852 = vmatmul.msk.f32.vlgmr.msra.gmra.mxu1 %vm692_vm9, %v844_v51 }
0x11b4   :  { %1317 = vmatpush.msra.mxu1 %v2251_v19 }
0x11b6   :  { %1318 = vmatpush.msra.mxu1 %v2256_v20 }
0x11b8   :  { %1319 = vmatpush.msra.mxu1 %v2265_v31 }
0x1230   :  { %v865_v52 = vpop.f32.mrf.mxu1 }
0x1231   :  { %v866_v53 = vadd.f32 %v2442_v47, %v865_v52 }
0x1233   :  { %v871_v54 = vsel %vm745_vm15, %v866_v53, -inf  ;;  %v869_v50 = vmul.f32 0.2, %v866_v53  ;;  %vm868_vm10 = vcmp.gt.f32.partialorder %v866_v53, 0.0 }
0x1234   :  { %872 = vmax.xlane.f32.xlu2 %v871_v54 }
0x1235   :  { %v2537_v54 = vsel %vm868_vm10, %v866_v53, %v869_v50 }
0x12a7   :  { %v873_v57 = vpop.xlane.xlu2 %872 }
0x12a8   :  { %v874_v58 = vsub.f32 %v866_v53, %v873_v57 }
0x12aa   :  { %v875_v12 = vmul.f32 1.442695, %v874_v58 }
0x12ac   :  { %1953 = vpow2.f32 %v875_v12  ;;  %v917_v12 = vpop.permute.xlu1 %916 }
0x12b2   :  { %v1954_v61 = vpop.eup %1953 }
0x12b3   :  { %878 = vrot.lane.b32.xlu0 %v1954_v61, %s2095_s0 }
0x1325   :  { %v879_v63 = vpop.permute.xlu0 %878 }
0x1326   :  { %v881_v1 = vsel %vm756_vm5, %v879_v63, 0.0 }
0x1327   :  { %882 = vadd.xlane.f32.xlu2 %v881_v1 }
0x139a   :  { %v883_v2 = vpop.xlane.xlu2 %882 }
0x139b   :  { %1955 = vrcp.f32 %v883_v2  ;;  %v895_v9 = vand.u32 2147483648, %v883_v2  ;;  %v893_v59 = vand.u32 2147483647, %v883_v2  ;;  %vm889_vm3 = vweird.f32 %v883_v2 }
0x139d   :  { %v896_v49 = vor.u32 1.1754944e-38, %v895_v9  ;;  %vm894_vm8 = vcmp.eq.f32.partialorder %v893_v59, 8.507059e+37 }
0x13a1   :  { %v1956_v3 = vpop.eup %1955 }
0x13a2   :  { %v885_v5 = vmul.f32 %v1956_v3, %v883_v2  ;;  %vm890_vm2 = vweird.f32 %v1956_v3 }
0x13a3   :  { %vm891_vm4 = vmor %vm889_vm3, %vm890_vm2 }
0x13a4   :  { %v886_v11 = vsub.f32 1.0, %v885_v5 }
0x13a6   :  { %v887_v4 = vmul.f32 %v1956_v3, %v886_v11 }
0x13a8   :  { %v888_v60 = vadd.f32 %v1956_v3, %v887_v4 }
0x13aa   :  { %v892_v35 = vsel %vm891_vm4, %v1956_v3, %v888_v60 }
0x13ab   :  { %v897_v42 = vsel %vm894_vm8, %v896_v49, %v892_v35 }
0x13ac   :  { %v2532_v27 = vmul.f32 %v1954_v61, %v897_v42 }
0x13ae   :  { %v899_v43 = vmul.f32 0.5, %v2532_v27 }
0x13b0   :  { %v900_v44 = vmul.f32 1.442695, %v899_v43 }
0x13b2   :  { %1957 = vpow2.f32 %v900_v44 }
0x13b8   :  { %v1958_v7 = vpop.eup %1957 }
0x13b9   :  { %v903_v46 = vrot.slane %v1958_v7, 6 }
0x13bb   :  { %904 = vrot.lane.b32.xlu0 %v903_v46, %s2095_s0 }
0x142d   :  { %v905_v48 = vpop.permute.xlu0 %904 }
0x142e   :  { %v907_v51 = vmul.f32 %v905_v48, %v2475_v10 }
0x1430   :  { %v909_v52 = vrot.slane %v907_v51, 2 }
0x1432   :  { %v2540_v57 = vadd.f32 %v909_v52, %v2537_v54 }
0x1434   :  { %913 = vrot.lane.b32.xlu2 %v2540_v57, %s2092_s4 }
0x148e   :  { %v914_v58 = vpop.permute.xlu2 %913 }
0x148f   :  { %v919_v61 = vsel %vm82_vm0, %v2484_v29, %v914_v58 }
0x1490   :  { %v920_v63 = vsel %vm663_vm6, %v919_v61, %v917_v12 }
0x1491   :  { %1853 = vmatmul.msk.f32.vlgmr.msrb.gmra.mxu3 %vm665_vm7, %v920_v63 }
0x1492   :  { %1112 = vmatpush.msrb.mxu3 %v2360_v13 }
0x1494   :  { %1113 = vmatpush.msrb.mxu3 %v2365_v14 }
0x1496   :  { %1114 = vmatpush.msrb.mxu3 %v2372_v15 }
0x1498   :  { %1115 = vmatpush.msrb.mxu3 %v2379_v16 }
0x149a   :  { %1116 = vmatpush.msrb.mxu3 %v2394_v22 }
0x149c   :  { %1117 = vmatpush.msrb.mxu3 %v2399_v23 }
0x149e   :  { %1118 = vmatpush.msrb.mxu3 %v2406_v24 }
0x14a0   :  { %1119 = vmatpush.msrb.mxu3 %v2413_v25 }
0x1514   :  { %v941_v53 = vpop.f32.mrf.mxu3 }
0x1515   :  { %v942_v1 = vadd.f32 %v2338_v41, %v941_v53 }
0x1517   :  { %vm944_vm11 = vcmp.gt.f32.partialorder %v942_v1, 0.0  ;;  %v945_v2 = vmul.f32 0.2, %v942_v1 }
0x1519   :  { %v946_v3 = vsel %vm944_vm11, %v942_v1, %v945_v2 }
0x151a   :  { %1854 = vmatmul.msk.f32.vlgmr.msrb.gmra.mxu0 %vm692_vm9, %v946_v3 }
0x151b   :  { %1240 = vmatpush.msrb.mxu0 %v2360_v13 }
0x151d   :  { %1241 = vmatpush.msrb.mxu0 %v2365_v14 }
0x151f   :  { %1242 = vmatpush.msrb.mxu0 %v2372_v15 }
0x1521   :  { %1243 = vmatpush.msrb.mxu0 %v2379_v16 }
0x1523   :  { %1244 = vmatpush.msrb.mxu0 %v2394_v22 }
0x1525   :  { %1245 = vmatpush.msrb.mxu0 %v2399_v23 }
0x1527   :  { %1246 = vmatpush.msrb.mxu0 %v2406_v24 }
0x1529   :  { %1247 = vmatpush.msrb.mxu0 %v2413_v25 }
0x1597   :  { %v967_v5 = vpop.f32.mrf.mxu0 }
0x1598   :  { %v968_v11 = vadd.f32 %v2422_v28, %v967_v5 }
0x159a   :  { %vm970_vm12 = vcmp.gt.f32.partialorder %v968_v11, 0.0  ;;  %v971_v9 = vmul.f32 0.2, %v968_v11 }
0x159c   :  { %v972_v4 = vsel %vm970_vm12, %v968_v11, %v971_v9 }
0x159d   :  { %1855 = vmatmul.msk.f32.vlgmr.msra.gmra.mxu2 %vm692_vm9, %v972_v4 }
0x159e   :  { %1445 = vmatpush.msra.mxu2 %v2251_v19 }
0x15a0   :  { %1446 = vmatpush.msra.mxu2 %v2256_v20 }
0x15a2   :  { %1447 = vmatpush.msra.mxu2 %v2265_v31 }
0x1620   :  { %v993_v59 = vpop.f32.mrf.mxu2 }
0x1621   :  { %v994_v60 = vadd.f32 %v2442_v47, %v993_v59 }
0x1623   :  { %v999_v49 = vsel %vm745_vm15, %v994_v60, -inf  ;;  %vm996_vm3 = vcmp.gt.f32.partialorder %v994_v60, 0.0 }
0x1624   :  { %1000 = vmax.xlane.f32.xlu0 %v999_v49  ;;  %v997_v49 = vmul.f32 0.2, %v994_v60 }
0x1697   :  { %v1001_v35 = vpop.xlane.xlu0 %1000 }
0x1698   :  { %v1002_v42 = vsub.f32 %v994_v60, %v1001_v35 }
0x169a   :  { %v1003_v43 = vmul.f32 1.442695, %v1002_v42 }
0x169c   :  { %1959 = vpow2.f32 %v1003_v43  ;;  %v2580_v43 = vsel %vm996_vm3, %v994_v60, %v997_v49 }
0x16a2   :  { %v1960_v44 = vpop.eup %1959 }
0x16a3   :  { %1006 = vrot.lane.b32.xlu1 %v1960_v44, %s2095_s0 }
0x1715   :  { %v1007_v7 = vpop.permute.xlu1 %1006 }
0x1716   :  { %v1009_v46 = vsel %vm756_vm5, %v1007_v7, 0.0 }
0x1717   :  { %1010 = vadd.xlane.f32.xlu1 %v1009_v46 }
0x178a   :  { %v1011_v48 = vpop.xlane.xlu1 %1010 }
0x178b   :  { %1961 = vrcp.f32 %v1011_v48  ;;  %v1023_v58 = vand.u32 2147483648, %v1011_v48  ;;  %v1021_v61 = vand.u32 2147483647, %v1011_v48  ;;  %vm1017_vm14 = vweird.f32 %v1011_v48 }
0x178d   :  { %v1024_v53 = vor.u32 1.1754944e-38, %v1023_v58  ;;  %vm1022_vm2 = vcmp.eq.f32.partialorder %v1021_v61, 8.507059e+37 }
0x1791   :  { %v1962_v50 = vpop.eup %1961 }
0x1792   :  { %v1013_v51 = vmul.f32 %v1962_v50, %v1011_v48  ;;  %vm1018_vm13 = vweird.f32 %v1962_v50 }
0x1793   :  { %vm1019_vm1 = vmor %vm1017_vm14, %vm1018_vm13 }
0x1794   :  { %v1014_v52 = vsub.f32 1.0, %v1013_v51 }
0x1796   :  { %v1015_v12 = vmul.f32 %v1962_v50, %v1014_v52 }
0x1798   :  { %v1016_v63 = vadd.f32 %v1962_v50, %v1015_v12 }
0x179a   :  { %v1020_v1 = vsel %vm1019_vm1, %v1962_v50, %v1016_v63 }
0x179b   :  { %v1025_v2 = vsel %vm1022_vm2, %v1024_v53, %v1020_v1 }
0x179c   :  { %v2575_v3 = vmul.f32 %v1960_v44, %v1025_v2 }
0x179e   :  { %v1027_v5 = vmul.f32 0.5, %v2575_v3 }
0x17a0   :  { %v1028_v11 = vmul.f32 1.442695, %v1027_v5 }
0x17a2   :  { %1963 = vpow2.f32 %v1028_v11 }
0x17a8   :  { %v1964_v9 = vpop.eup %1963 }
0x17a9   :  { %v1031_v4 = vrot.slane %v1964_v9, 4 }
0x17ab   :  { %1032 = vrot.lane.b32.xlu2 %v1031_v4, %s2095_s0 }
0x1805   :  { %v1033_v59 = vpop.permute.xlu2 %1032 }
0x1806   :  { %v1035_v35 = vmul.f32 %v1033_v59, %v2475_v10 }
0x1808   :  { %v1037_v42 = vrot.slane %v1035_v35, 4 }
0x180a   :  { %v2583_v7 = vadd.f32 %v1037_v42, %v2580_v43 }
0x180c   :  { %1041 = vrot.lane.b32.xlu2 %v2583_v7, %s2092_s4 }
0x1814   :  { %1044 = vrot.lane.b32.xlu2 %v385_v56, %s2095_s0 }
0x1866   :  { %v1042_v44 = vpop.permute.xlu2 %1041 }
0x1867   :  { %v1047_v46 = vsel %vm82_vm0, %v2540_v57, %v1042_v44 }
0x186e   :  { %v1045_v48 = vpop.permute.xlu2 %1044 }
0x186f   :  { %v1048_v50 = vsel %vm663_vm6, %v1047_v46, %v1045_v48 }
0x1870   :  { %1856 = vmatmul.msk.f32.vlgmr.msra.gmra.mxu3 %vm665_vm7, %v1048_v50 }
0x1871   :  { %1338 = vmatpush.msra.mxu3 %v2278_v30 }
0x1873   :  { %1339 = vmatpush.msra.mxu3 %v2283_v32 }
0x1875   :  { %1340 = vmatpush.msra.mxu3 %v2290_v33 }
0x1877   :  { %1341 = vmatpush.msra.mxu3 %v2297_v34 }
0x1879   :  { %1342 = vmatpush.msra.mxu3 %v2310_v37 }
0x187b   :  { %1343 = vmatpush.msra.mxu3 %v2315_v38 }
0x187d   :  { %1344 = vmatpush.msra.mxu3 %v2322_v39 }
0x187f   :  { %1345 = vmatpush.msra.mxu3 %v2329_v40 }
0x18f3   :  { %v1069_v55 = vpop.f32.mrf.mxu3 }
0x18f4   :  { %v1070_v56 = vadd.f32 %v2338_v41, %v1069_v55 }
0x18f6   :  { %vm1072_vm4 = vcmp.gt.f32.partialorder %v1070_v56, 0.0  ;;  %v1073_v60 = vmul.f32 0.2, %v1070_v56 }
0x18f8   :  { %v1074_v51 = vsel %vm1072_vm4, %v1070_v56, %v1073_v60 }
0x18f9   :  { %1857 = vmatmul.msk.f32.vlgmr.msrb.gmra.mxu1 %vm692_vm9, %v1074_v51 }
0x18fa   :  { %1364 = vmatpush.msrb.mxu1 %v2360_v13 }
0x18fc   :  { %1365 = vmatpush.msrb.mxu1 %v2365_v14 }
0x18fe   :  { %1366 = vmatpush.msrb.mxu1 %v2372_v15 }
0x1900   :  { %1367 = vmatpush.msrb.mxu1 %v2379_v16 }
0x1902   :  { %1368 = vmatpush.msrb.mxu1 %v2394_v22 }
0x1904   :  { %1369 = vmatpush.msrb.mxu1 %v2399_v23 }
0x1906   :  { %1370 = vmatpush.msrb.mxu1 %v2406_v24 }
0x1908   :  { %1371 = vmatpush.msrb.mxu1 %v2413_v25 }
0x1976   :  { %v1095_v52 = vpop.f32.mrf.mxu1 }
0x1977   :  { %v1096_v58 = vadd.f32 %v2422_v28, %v1095_v52 }
0x1979   :  { %vm1098_vm8 = vcmp.gt.f32.partialorder %v1096_v58, 0.0  ;;  %v1099_v12 = vmul.f32 0.2, %v1096_v58 }
0x197b   :  { %v1100_v61 = vsel %vm1098_vm8, %v1096_v58, %v1099_v12 }
0x197c   :  { %1858 = vmatmul.msk.f32.vlgmr.msrb.gmra.mxu3 %vm692_vm9, %v1100_v61 }
0x197d   :  { %1575 = vmatpush.msrb.mxu3 %v2251_v19 }
0x197f   :  { %1576 = vmatpush.msrb.mxu3 %v2256_v20 }
0x1981   :  { %1577 = vmatpush.msrb.mxu3 %v2265_v31 }
0x19ff   :  { %v1121_v63 = vpop.f32.mrf.mxu3 }
0x1a00   :  { %v1122_v53 = vadd.f32 %v2442_v47, %v1121_v63 }
0x1a02   :  { %v1127_v1 = vsel %vm745_vm15, %v1122_v53, -inf  ;;  %v1125_v61 = vmul.f32 0.2, %v1122_v53  ;;  %vm1124_vm14 = vcmp.gt.f32.partialorder %v1122_v53, 0.0 }
0x1a03   :  { %1128 = vmax.xlane.f32.xlu2 %v1127_v1 }
0x1a76   :  { %v1129_v2 = vpop.xlane.xlu2 %1128 }
0x1a77   :  { %v1130_v5 = vsub.f32 %v1122_v53, %v1129_v2  ;;  %v2626_v2 = vsel %vm1124_vm14, %v1122_v53, %v1125_v61 }
0x1a79   :  { %v1131_v11 = vmul.f32 1.442695, %v1130_v5 }
0x1a7b   :  { %1965 = vpow2.f32 %v1131_v11 }
0x1a81   :  { %v1966_v9 = vpop.eup %1965 }
0x1a82   :  { %1134 = vrot.lane.b32.xlu0 %v1966_v9, %s2095_s0 }
0x1af4   :  { %v1135_v4 = vpop.permute.xlu0 %1134 }
0x1af5   :  { %v1137_v19 = vsel %vm756_vm5, %v1135_v4, 0.0 }
0x1af6   :  { %1138 = vadd.xlane.f32.xlu1 %v1137_v19 }
0x1b69   :  { %v1139_v20 = vpop.xlane.xlu1 %1138 }
0x1b6a   :  { %1967 = vrcp.f32 %v1139_v20  ;;  %v1151_v35 = vand.u32 2147483648, %v1139_v20  ;;  %v1149_v44 = vand.u32 2147483647, %v1139_v20  ;;  %vm1145_vm11 = vweird.f32 %v1139_v20 }
0x1b6c   :  { %v1152_v48 = vor.u32 1.1754944e-38, %v1151_v35  ;;  %vm1150_vm13 = vcmp.eq.f32.partialorder %v1149_v44, 8.507059e+37 }
0x1b70   :  { %v1968_v31 = vpop.eup %1967 }
0x1b71   :  { %v1141_v59 = vmul.f32 %v1968_v31, %v1139_v20  ;;  %vm1146_vm10 = vweird.f32 %v1968_v31 }
0x1b72   :  { %vm1147_vm12 = vmor %vm1145_vm11, %vm1146_vm10 }
0x1b73   :  { %v1142_v49 = vsub.f32 1.0, %v1141_v59 }
0x1b75   :  { %v1143_v42 = vmul.f32 %v1968_v31, %v1142_v49 }
0x1b77   :  { %v1144_v46 = vadd.f32 %v1968_v31, %v1143_v42 }
0x1b79   :  { %v1148_v50 = vsel %vm1147_vm12, %v1968_v31, %v1144_v46 }
0x1b7a   :  { %v1153_v55 = vsel %vm1150_vm13, %v1152_v48, %v1148_v50 }
0x1b7b   :  { %v2621_v56 = vmul.f32 %v1966_v9, %v1153_v55 }
0x1b7d   :  { %v1155_v60 = vmul.f32 0.5, %v2621_v56 }
0x1b7f   :  { %v1156_v51 = vmul.f32 1.442695, %v1155_v60 }
0x1b81   :  { %1969 = vpow2.f32 %v1156_v51 }
0x1b87   :  { %v1970_v52 = vpop.eup %1969 }
0x1b88   :  { %v1159_v58 = vrot.slane %v1970_v52, 2 }
0x1b8a   :  { %1160 = vrot.lane.b32.xlu1 %v1159_v58, %s2095_s0 }
0x1bfc   :  { %v1161_v12 = vpop.permute.xlu1 %1160 }
0x1bfd   :  { %v1163_v63 = vmul.f32 %v1161_v12, %v2475_v10 }
0x1bff   :  { %v1165_v1 = vrot.slane %v1163_v63, 6 }
0x1c01   :  { %v2629_v5 = vadd.f32 %v1165_v1, %v2626_v2  ;;  %v2673_v1 = vld [vmem:[%s2881_s1 + $0x8] sm:$0xff]  ;;  %s2099_s1 = smov 32  }
0x1c03   :  { %1169 = vrot.lane.b32.xlu0 %v2629_v5, %s2092_s4 }
0x1c0b   :  { %1172 = vrot.lane.b32.xlu0 %v2303_v36, %s2095_s0 }
0x1c75   :  { %v1170_v11 = vpop.permute.xlu0 %1169 }
0x1c76   :  { %v1175_v9 = vsel %vm82_vm0, %v2583_v7, %v1170_v11 }
0x1c7d   :  { %v1173_v4 = vpop.permute.xlu0 %1172 }
0x1c7e   :  { %v1176_v19 = vsel %vm663_vm6, %v1175_v9, %v1173_v4 }
0x1c7f   :  { %1859 = vmatmul.msk.f32.vlgmr.msra.gmra.mxu0 %vm665_vm7, %v1176_v19 }
0x1c80   :  { %1466 = vmatpush.msra.mxu0 %v2278_v30 }
0x1c82   :  { %1467 = vmatpush.msra.mxu0 %v2283_v32 }
0x1c84   :  { %1468 = vmatpush.msra.mxu0 %v2290_v33 }
0x1c86   :  { %1469 = vmatpush.msra.mxu0 %v2297_v34 }
0x1c88   :  { %1470 = vmatpush.msra.mxu0 %v2310_v37 }
0x1c8a   :  { %1471 = vmatpush.msra.mxu0 %v2315_v38 }
0x1c8c   :  { %1472 = vmatpush.msra.mxu0 %v2322_v39 }
0x1c8e   :  { %1473 = vmatpush.msra.mxu0 %v2329_v40 }
0x1cfc   :  { %v1197_v36 = vpop.f32.mrf.mxu0 }
0x1cfd   :  { %v1198_v10 = vadd.f32 %v2338_v41, %v1197_v36 }
0x1cff   :  { %vm1200_vm1 = vcmp.gt.f32.partialorder %v1198_v10, 0.0  ;;  %v1201_v53 = vmul.f32 0.2, %v1198_v10 }
0x1d01   :  { %v1202_v30 = vsel %vm1200_vm1, %v1198_v10, %v1201_v53 }
0x1d02   :  { %1860 = vmatmul.msk.f32.vlgmr.msrb.gmra.mxu2 %vm692_vm9, %v1202_v30 }
0x1d03   :  { %1492 = vmatpush.msrb.mxu2 %v2360_v13 }
0x1d05   :  { %1493 = vmatpush.msrb.mxu2 %v2365_v14 }
0x1d07   :  { %1494 = vmatpush.msrb.mxu2 %v2372_v15 }
0x1d09   :  { %1495 = vmatpush.msrb.mxu2 %v2379_v16 }
0x1d0b   :  { %1496 = vmatpush.msrb.mxu2 %v2394_v22 }
0x1d0d   :  { %1497 = vmatpush.msrb.mxu2 %v2399_v23 }
0x1d0f   :  { %1498 = vmatpush.msrb.mxu2 %v2406_v24 }
0x1d11   :  { %1499 = vmatpush.msrb.mxu2 %v2413_v25 }
0x1d85   :  { %v1223_v32 = vpop.f32.mrf.mxu2 }
0x1d86   :  { %v1224_v33 = vadd.f32 %v2422_v28, %v1223_v32 }
0x1d88   :  { %vm1226_vm2 = vcmp.gt.f32.partialorder %v1224_v33, 0.0  ;;  %v1227_v34 = vmul.f32 0.2, %v1224_v33 }
0x1d8a   :  { %v1228_v37 = vsel %vm1226_vm2, %v1224_v33, %v1227_v34  ;;  %v2003_v33 = vld [vmem:[%s2887_s7 + $0x38] sm:$0xff]  ;;  %v2004_v34 = vld [vmem:[%s2887_s7 + $0x30] sm:$0xff] }
0x1d8b   :  { %1861 = vmatmul.msk.f32.vlgmr.msrb.gmra.mxu0 %vm692_vm9, %v1228_v37  ;;  %v2005_v37 = vld [vmem:[%s2887_s7 + $0x28] sm:$0xff] }
0x1e08   :  { %v1249_v38 = vpop.f32.mrf.mxu0 }
0x1e09   :  { %v1250_v39 = vadd.f32 %v2442_v47, %v1249_v38  ;;  %v2006_v38 = vld [vmem:[%s2887_s7 + $0x20] sm:$0xff] }
0x1e0b   :  { %v1255_v40 = vsel %vm745_vm15, %v1250_v39, -inf  ;;  %v1253_v11 = vmul.f32 0.2, %v1250_v39  ;;  %vm1252_vm11 = vcmp.gt.f32.partialorder %v1250_v39, 0.0 }
0x1e0c   :  { %1256 = vmax.xlane.f32.xlu0 %v1255_v40  ;;  %v2008_v40 = vld [vmem:[%s2887_s7 + $0x10] sm:$0xff] }
0x1e0d   :  { %v2676_v19 = vsel %vm1252_vm11, %v1250_v39, %v1253_v11 }
0x1e20   :  { %1296 = vrot.lane.b32.xlu0 %v521_v21, %s2095_s0 }
0x1e7f   :  { %v1257_v41 = vpop.xlane.xlu0 %1256 }
0x1e80   :  { %v1258_v20 = vsub.f32 %v1250_v39, %v1257_v41  ;;  %v2007_v39 = vld [vmem:[%s2887_s7 + $0x18] sm:$0xff]  ;;  %v2009_v41 = vld [vmem:[%s2887_s7 + $0x8] sm:$0xff] }
0x1e82   :  { %v1259_v31 = vmul.f32 1.442695, %v1258_v20  ;;  %v2010_v20 = vld [vmem:[%s2887_s7] sm:$0xff] }
0x1e84   :  { %1971 = vpow2.f32 %v1259_v31 }
0x1e8a   :  { %v1972_v59 = vpop.eup %1971 }
0x1e8b   :  { %1262 = vrot.lane.b32.xlu2 %v1972_v59, %s2095_s0 }
0x1e92   :  { %v1297_v53 = vpop.permute.xlu0 %1296 }
0x1ee5   :  { %v1263_v49 = vpop.permute.xlu2 %1262 }
0x1ee6   :  { %v1265_v35 = vsel %vm756_vm5, %v1263_v49, 0.0 }
0x1ee7   :  { %1266 = vadd.xlane.f32.xlu1 %v1265_v35 }
0x1f5a   :  { %v1267_v42 = vpop.xlane.xlu1 %1266 }
0x1f5b   :  { %1973 = vrcp.f32 %v1267_v42  ;;  %v1279_v50 = vand.u32 2147483648, %v1267_v42  ;;  %v1277_v18 = vand.u32 2147483647, %v1267_v42  ;;  %vm1273_vm4 = vweird.f32 %v1267_v42 }
0x1f5d   :  { %v1280_v60 = vor.u32 1.1754944e-38, %v1279_v50  ;;  %vm1278_vm10 = vcmp.eq.f32.partialorder %v1277_v18, 8.507059e+37 }
0x1f61   :  { %v1974_v44 = vpop.eup %1973 }
0x1f62   :  { %v1269_v46 = vmul.f32 %v1974_v44, %v1267_v42  ;;  %vm1274_vm3 = vweird.f32 %v1974_v44 }
0x1f63   :  { %vm1275_vm8 = vmor %vm1273_vm4, %vm1274_vm3 }
0x1f64   :  { %v1270_v48 = vsub.f32 1.0, %v1269_v46 }
0x1f66   :  { %v1271_v55 = vmul.f32 %v1974_v44, %v1270_v48 }
0x1f68   :  { %v1272_v21 = vadd.f32 %v1974_v44, %v1271_v55 }
0x1f6a   :  { %v1276_v51 = vsel %vm1275_vm8, %v1974_v44, %v1272_v21 }
0x1f6b   :  { %v1281_v52 = vsel %vm1278_vm10, %v1280_v60, %v1276_v51 }
0x1f6c   :  { %v2666_v58 = vmul.f32 %v1972_v59, %v1281_v52  ;;  %v2714_v59 = vld [vmem:[%s2886_s6] ss:$0 sm:$0xff] }
0x1f6e   :  { %v1283_v12 = vmul.f32 0.5, %v2666_v58 }
0x1f70   :  { %v1284_v61 = vmul.f32 1.442695, %v1283_v12 }
0x1f72   :  { %1975 = vpow2.f32 %v1284_v61 }
0x1f78   :  { %v1976_v63 = vpop.eup %1975 }
0x1f79   :  { %1287 = vrot.lane.b32.xlu2 %v1976_v63, %s2095_s0 }
0x1fd3   :  { %v1288_v9 = vpop.permute.xlu2 %1287 }
0x1fd4   :  { %v1290_v4 = vmul.f32 %v1288_v9, %v2673_v1 }
0x1fd6   :  { %v2679_v36 = vadd.f32 %v1290_v4, %v2676_v19 }
0x1fd8   :  { %1293 = vrot.lane.b32.xlu2 %v2679_v36, %s2092_s4 }
0x2032   :  { %v1294_v10 = vpop.permute.xlu2 %1293 }
0x2033   :  { %v1299_v30 = vsel %vm82_vm0, %v2629_v5, %v1294_v10 }
0x2034   :  { %v1300_v32 = vsel %vm663_vm6, %v1299_v30, %v1297_v53 }
0x2035   :  { %1862 = vmatmul.msk.f32.vlgmr.msra.gmra.mxu1 %vm665_vm7, %v1300_v32 }
0x2036   :  { %1596 = vmatpush.msra.mxu1 %v2003_v33 }
0x2038   :  { %1597 = vmatpush.msra.mxu1 %v2004_v34 }
0x203a   :  { %1598 = vmatpush.msra.mxu1 %v2005_v37 }
0x203c   :  { %1599 = vmatpush.msra.mxu1 %v2006_v38 }
0x203e   :  { %1600 = vmatpush.msra.mxu1 %v2007_v39 }
0x2040   :  { %1601 = vmatpush.msra.mxu1 %v2008_v40 }
0x2042   :  { %1602 = vmatpush.msra.mxu1 %v2009_v41 }
0x2044   :  { %1603 = vmatpush.msra.mxu1 %v2010_v20 }
0x20b2   :  { %v1321_v31 = vpop.f32.mrf.mxu1 }
0x20b3   :  { %v1322_v49 = vadd.f32 %v2714_v59, %v1321_v31 }
0x20b5   :  { %vm1324_vm12 = vcmp.gt.f32.partialorder %v1322_v49, 0.0  ;;  %v1325_v35 = vmul.f32 0.2, %v1322_v49 }
0x20b7   :  { %v1326_v42 = vsel %vm1324_vm12, %v1322_v49, %v1325_v35 }
0x20b8   :  { %1863 = vmatmul.msk.f32.vlgmr.msra.gmra.mxu3 %vm692_vm9, %v1326_v42 }
0x20b9   :  { %1622 = vmatpush.msra.mxu3 %v2360_v13 }
0x20bb   :  { %1623 = vmatpush.msra.mxu3 %v2365_v14 }
0x20bd   :  { %1624 = vmatpush.msra.mxu3 %v2372_v15 }
0x20bf   :  { %1625 = vmatpush.msra.mxu3 %v2379_v16 }
0x20c1   :  { %1626 = vmatpush.msra.mxu3 %v2394_v22  ;;  %v617_v22 = vrot.slane %v2511_v26, 2 }
0x20c3   :  { %1627 = vmatpush.msra.mxu3 %v2399_v23  ;;  %v2732_v23 = vadd.f32 %v617_v22, %v2241_v62 }
0x20c5   :  { %1628 = vmatpush.msra.mxu3 %v2406_v24  ;;  %1977 = vtanh.f32 %v2732_v23 }
0x20c7   :  { %1629 = vmatpush.msra.mxu3 %v2413_v25 }
0x20cb   :  { %v1978_v24 = vpop.eup %1977 }
0x213b   :  { %v1347_v44 = vpop.f32.mrf.mxu3 }
0x213c   :  { %v1348_v46 = vadd.f32 %v2422_v28, %v1347_v44 }
0x213e   :  { %vm1350_vm13 = vcmp.gt.f32.partialorder %v1348_v46, 0.0  ;;  %v1351_v48 = vmul.f32 0.2, %v1348_v46 }
0x2140   :  { %v1352_v13 = vsel %vm1350_vm13, %v1348_v46, %v1351_v48  ;;  %v2762_v46 = vld [vmem:[%s2888_s8] ss:$0 sm:$0xff]  ;;  %s2096_s8 = smov 56  }
0x2141   :  { %1864 = vmatmul.msk.f32.vlgmr.msrb.gmra.mxu1 %vm692_vm9, %v1352_v13 }
0x21be   :  { %v1373_v14 = vpop.f32.mrf.mxu1 }
0x21bf   :  { %v1374_v15 = vadd.f32 %v2442_v47, %v1373_v14 }
0x21c1   :  { %v1379_v16 = vsel %vm745_vm15, %v1374_v15, -inf  ;;  %v1377_v32 = vmul.f32 0.2, %v1374_v15  ;;  %vm1376_vm4 = vcmp.gt.f32.partialorder %v1374_v15, 0.0 }
0x21c2   :  { %1380 = vmax.xlane.f32.xlu2 %v1379_v16  ;;  %v2769_v16 = vld [vmem:[%s2890_s10] ss:$0 sm:$0xff]  ;;  %s2097_s10 = smov 48  }
0x21c3   :  { %v2746_v37 = vsel %vm1376_vm4, %v1374_v15, %v1377_v32 }
0x21da   :  { %1424 = vrot.lane.b32.xlu2 %v591_v8, %s2095_s0 }
0x21e2   :  { %645 = vrot.lane.b32.xlu2 %v1978_v24, %s2091_s3 }
0x2235   :  { %v1381_v25 = vpop.xlane.xlu2 %1380 }
0x2236   :  { %v1382_v28 = vsub.f32 %v1374_v15, %v1381_v25  ;;  %v620_v25 = vsub.f32 0.0, %v2732_v23 }
0x2238   :  { %v1383_v47 = vmul.f32 1.442695, %v1382_v28  ;;  %v621_v28 = vmul.f32 1.442695, %v620_v25 }
0x223a   :  { %1979 = vpow2.f32 %v1383_v47 }
0x223d   :  { %v1425_v40 = vpop.permute.xlu2 %1424 }
0x2240   :  { %v1980_v50 = vpop.eup %1979 }
0x2241   :  { %1386 = vrot.lane.b32.xlu1 %v1980_v50, %s2095_s0 }
0x22b3   :  { %v1387_v26 = vpop.permute.xlu1 %1386 }
0x22b4   :  { %v1389_v62 = vsel %vm756_vm5, %v1387_v26, 0.0 }
0x22b5   :  { %1390 = vadd.xlane.f32.xlu0 %v1389_v62 }
0x2328   :  { %v1391_v55 = vpop.xlane.xlu0 %1390 }
0x2329   :  { %1981 = vrcp.f32 %v1391_v55  ;;  %v1403_v21 = vand.u32 2147483648, %v1391_v55  ;;  %v1401_v51 = vand.u32 2147483647, %v1391_v55  ;;  %vm1397_vm1 = vweird.f32 %v1391_v55 }
0x232b   :  { %v1404_v12 = vor.u32 1.1754944e-38, %v1403_v21  ;;  %vm1402_vm3 = vcmp.eq.f32.partialorder %v1401_v51, 8.507059e+37 }
0x232f   :  { %v1982_v6 = vpop.eup %1981 }
0x2330   :  { %v1393_v8 = vmul.f32 %v1982_v6, %v1391_v55  ;;  %vm1398_vm14 = vweird.f32 %v1982_v6 }
0x2331   :  { %vm1399_vm2 = vmor %vm1397_vm1, %vm1398_vm14 }
0x2332   :  { %v1394_v18 = vsub.f32 1.0, %v1393_v8 }
0x2334   :  { %v1395_v60 = vmul.f32 %v1982_v6, %v1394_v18 }
0x2336   :  { %v1396_v52 = vadd.f32 %v1982_v6, %v1395_v60 }
0x2338   :  { %v1400_v61 = vsel %vm1399_vm2, %v1982_v6, %v1396_v52 }
0x2339   :  { %v1405_v63 = vsel %vm1402_vm3, %v1404_v12, %v1400_v61 }
0x233a   :  { %v2741_v11 = vmul.f32 %v1980_v50, %v1405_v63  ;;  %v646_v63 = vpop.permute.xlu2 %645 }
0x233c   :  { %v1407_v9 = vmul.f32 0.5, %v2741_v11 }
0x233e   :  { %v1408_v4 = vmul.f32 1.442695, %v1407_v9 }
0x2340   :  { %1983 = vpow2.f32 %v1408_v4 }
0x2341   :  { %1985 = vpow2.f32 %v621_v28 }
0x2346   :  { %v1984_v10 = vpop.eup %1983 }
0x2347   :  { %v1411_v53 = vrot.slane %v1984_v10, 6  ;;  %v1986_v47 = vpop.eup %1985 }
0x2348   :  { %v623_v50 = vadd.f32 1.0, %v1986_v47 }
0x2349   :  { %1412 = vrot.lane.b32.xlu1 %v1411_v53, %s2095_s0 }
0x234a   :  { %1987 = vrcp.f32 %v623_v50  ;;  %v635_v52 = vand.u32 2147483648, %v623_v50  ;;  %vm629_vm12 = vweird.f32 %v623_v50  ;;  %v633_v23 = vand.u32 2147483647, %v623_v50 }
0x234c   :  { %v636_v61 = vor.u32 1.1754944e-38, %v635_v52  ;;  %vm634_vm14 = vcmp.eq.f32.partialorder %v633_v23, 8.507059e+37 }
0x2350   :  { %v1988_v26 = vpop.eup %1987 }
0x2351   :  { %v625_v62 = vmul.f32 %v1988_v26, %v623_v50  ;;  %vm630_vm11 = vweird.f32 %v1988_v26 }
0x2352   :  { %vm631_vm13 = vmor %vm629_vm12, %vm630_vm11 }
0x2353   :  { %v626_v8 = vsub.f32 1.0, %v625_v62 }
0x2355   :  { %v627_v21 = vmul.f32 %v1988_v26, %v626_v8 }
0x2357   :  { %v628_v60 = vadd.f32 %v1988_v26, %v627_v21 }
0x2359   :  { %v632_v12 = vsel %vm631_vm13, %v1988_v26, %v628_v60  ;;  %vm1707_vm13 = vcmask 326656  }
0x235a   :  { %v637_v9 = vsel %vm634_vm14, %v636_v61, %v632_v12 }
0x235b   :  { %v648_v4 = vmul.f32 %v646_v63, %v637_v9 }
0x23bb   :  { %v1413_v30 = vpop.permute.xlu1 %1412 }
0x23bc   :  { %v1415_v33 = vmul.f32 %v1413_v30, %v2673_v1  ;;  %v641_v30 = vrot.slane %v2455_v45, 6 }
0x23be   :  { %v1417_v34 = vrot.slane %v1415_v33, 2  ;;  %v643_v32 = vmul.f32 %v641_v30, %v637_v9 }
0x23c0   :  { %v2749_v38 = vadd.f32 %v1417_v34, %v2746_v37 }
0x23c2   :  { %1421 = vrot.lane.b32.xlu1 %v2749_v38, %s2092_s4 }
0x2434   :  { %v1422_v39 = vpop.permute.xlu1 %1421 }
0x2435   :  { %v1427_v41 = vsel %vm82_vm0, %v2679_v36, %v1422_v39 }
0x2436   :  { %v1428_v20 = vsel %vm663_vm6, %v1427_v41, %v1425_v40 }
0x2437   :  { %1865 = vmatmul.msk.f32.vlgmr.msra.gmra.mxu2 %vm665_vm7, %v1428_v20 }
0x24ba   :  { %v1449_v31 = vpop.f32.mrf.mxu2 }
0x24bb   :  { %v1450_v49 = vadd.f32 %v2714_v59, %v1449_v31 }
0x24bd   :  { %vm1452_vm8 = vcmp.gt.f32.partialorder %v1450_v49, 0.0  ;;  %v1453_v35 = vmul.f32 0.2, %v1450_v49 }
0x24bf   :  { %v1454_v42 = vsel %vm1452_vm8, %v1450_v49, %v1453_v35 }
0x24c0   :  { %1866 = vmatmul.msk.f32.vlgmr.msra.gmra.mxu0 %vm692_vm9, %v1454_v42 }
0x253d   :  { %v1475_v44 = vpop.f32.mrf.mxu0 }
0x253e   :  { %v1476_v48 = vadd.f32 %v2762_v46, %v1475_v44 }
0x2540   :  { %vm1478_vm10 = vcmp.gt.f32.partialorder %v1476_v48, 0.0  ;;  %v1479_v13 = vmul.f32 0.2, %v1476_v48 }
0x2542   :  { %v1480_v14 = vsel %vm1478_vm10, %v1476_v48, %v1479_v13 }
0x2543   :  { %1867 = vmatmul.msk.f32.vlgmr.msrb.gmra.mxu2 %vm692_vm9, %v1480_v14 }
0x25c6   :  { %v1501_v15 = vpop.f32.mrf.mxu2 }
0x25c7   :  { %v2772_v22 = vadd.f32 %v2769_v16, %v1501_v15 }
0x25c9   :  { %v1507_v24 = vsel %vm745_vm15, %v2772_v22, -inf  ;;  %v1505_v50 = vmul.f32 0.2, %v2772_v22  ;;  %vm1504_vm8 = vcmp.gt.f32.partialorder %v2772_v22, 0.0 }
0x25ca   :  { %1508 = vmax.xlane.f32.xlu1 %v1507_v24 }
0x263d   :  { %v1509_v55 = vpop.xlane.xlu1 %1508 }
0x263e   :  { %v1510_v6 = vsub.f32 %v2772_v22, %v1509_v55  ;;  %v1506_v55 = vsel %vm1504_vm8, %v2772_v22, %v1505_v50  ;;  %vm1711_vm8 = vcmask 457728  }
0x2640   :  { %v1511_v18 = vmul.f32 1.442695, %v1510_v6 }
0x2642   :  { %1989 = vpow2.f32 %v1511_v18 }
0x2648   :  { %v1990_v51 = vpop.eup %1989 }
0x2649   :  { %1514 = vrot.lane.b32.xlu0 %v1990_v51, %s2095_s0 }
0x2651   :  { %650 = vrot.lane.b32.xlu0 %v648_v4, %s2092_s4 }
0x26bb   :  { %v1515_v10 = vpop.permute.xlu0 %1514 }
0x26bc   :  { %v1517_v53 = vsel %vm756_vm5, %v1515_v10, 0.0 }
0x26bd   :  { %1518 = vadd.xlane.f32.xlu2 %v1517_v53 }
0x26c3   :  { %v651_v33 = vpop.permute.xlu0 %650 }
0x26c4   :  { %v653_v34 = vadd.f32 %v651_v33, %v643_v32 }
0x26c6   :  { %1991 = vtanh.f32 %v653_v34 }
0x26cc   :  { %v1992_v39 = vpop.eup %1991 }
0x26cd   :  { %656 = vrot.lane.b32.xlu1 %v1992_v39, %s2093_s15 }
0x2730   :  { %v1519_v40 = vpop.xlane.xlu2 %1518 }
0x2731   :  { %1993 = vrcp.f32 %v1519_v40  ;;  %v1531_v49 = vand.u32 2147483648, %v1519_v40  ;;  %v1529_v42 = vand.u32 2147483647, %v1519_v40  ;;  %vm1525_vm2 = vweird.f32 %v1519_v40 }
0x2733   :  { %v1532_v45 = vor.u32 1.1754944e-38, %v1531_v49  ;;  %vm1530_vm4 = vcmp.eq.f32.partialorder %v1529_v42, 8.507059e+37 }
0x2737   :  { %v1994_v41 = vpop.eup %1993 }
0x2738   :  { %v1521_v20 = vmul.f32 %v1994_v41, %v1519_v40  ;;  %vm1526_vm1 = vweird.f32 %v1994_v41 }
0x2739   :  { %vm1527_vm3 = vmor %vm1525_vm2, %vm1526_vm1  ;;  %vm1709_vm1 = vcmask 392192  }
0x273a   :  { %v1522_v31 = vsub.f32 1.0, %v1521_v20 }
0x273c   :  { %v1523_v35 = vmul.f32 %v1994_v41, %v1522_v31 }
0x273e   :  { %v1524_v44 = vadd.f32 %v1994_v41, %v1523_v35 }
0x273f   :  { %v657_v8 = vpop.permute.xlu1 %656 }
0x2740   :  { %v1528_v48 = vsel %vm1527_vm3, %v1994_v41, %v1524_v44  ;;  %v659_v18 = vmul.f32 %v657_v8, %v637_v9 }
0x2741   :  { %v1533_v13 = vsel %vm1530_vm4, %v1532_v45, %v1528_v48  ;;  %vm1753_vm4 = vcmask 517120  }
0x2742   :  { %v2783_v14 = vmul.f32 %v1990_v51, %v1533_v13  ;;  %v1553_v21 = vrot.slane %v659_v18, 6 }
0x2744   :  { %v1535_v15 = vmul.f32 0.5, %v2783_v14 }
0x2746   :  { %v1536_v24 = vmul.f32 1.442695, %v1535_v15 }
0x2748   :  { %1995 = vpow2.f32 %v1536_v24 }
0x274e   :  { %v1996_v25 = vpop.eup %1995 }
0x274f   :  { %v1539_v28 = vrot.slane %v1996_v25, 4 }
0x2751   :  { %1540 = vrot.lane.b32.xlu0 %v1539_v28, %s2095_s0 }
0x27c3   :  { %v1541_v47 = vpop.permute.xlu0 %1540 }
0x27c4   :  { %v1543_v26 = vmul.f32 %v1541_v47, %v2673_v1 }
0x27c6   :  { %v1545_v62 = vrot.slane %v1543_v26, 4 }
0x27c8   :  { %v1547_v6 = vadd.f32 %v1545_v62, %v1506_v55 }
0x27ca   :  { %1549 = vrot.lane.b32.xlu0 %v1547_v6, %s2092_s4 }
0x27d2   :  { %1554 = vrot.lane.b32.xlu0 %v1553_v21, %s2095_s0 }
0x283c   :  { %v1550_v60 = vpop.permute.xlu0 %1549 }
0x283d   :  { %v1557_v51 = vsel %vm82_vm0, %v2749_v38, %v1550_v60 }
0x2844   :  { %v1555_v52 = vpop.permute.xlu0 %1554 }
0x2845   :  { %v1558_v23 = vsel %vm663_vm6, %v1557_v51, %v1555_v52 }
0x2846   :  { %1868 = vmatmul.msk.f32.vlgmr.msrb.gmra.mxu3 %vm665_vm7, %v1558_v23 }
0x28c9   :  { %v1579_v12 = vpop.f32.mrf.mxu3 }
0x28ca   :  { %v1580_v22 = vadd.f32 %v2714_v59, %v1579_v12 }
0x28cc   :  { %vm1582_vm10 = vcmp.gt.f32.partialorder %v1580_v22, 0.0  ;;  %v1583_v61 = vmul.f32 0.2, %v1580_v22 }
0x28ce   :  { %v1584_v63 = vsel %vm1582_vm10, %v1580_v22, %v1583_v61 }
0x28cf   :  { %1869 = vmatmul.msk.f32.vlgmr.msra.gmra.mxu1 %vm692_vm9, %v1584_v63 }
0x294c   :  { %v1605_v9 = vpop.f32.mrf.mxu1 }
0x294d   :  { %v1606_v4 = vadd.f32 %v2762_v46, %v1605_v9 }
0x294f   :  { %vm1608_vm11 = vcmp.gt.f32.partialorder %v1606_v4, 0.0  ;;  %v1609_v10 = vmul.f32 0.2, %v1606_v4 }
0x2951   :  { %v1610_v53 = vsel %vm1608_vm11, %v1606_v4, %v1609_v10 }
0x2952   :  { %1870 = vmatmul.msk.f32.vlgmr.msra.gmra.mxu3 %vm692_vm9, %v1610_v53 }
0x29d5   :  { %v1631_v30 = vpop.f32.mrf.mxu3 }
0x29d6   :  { %v1632_v32 = vadd.f32 %v2769_v16, %v1631_v30 }
0x29d8   :  { %v1637_v33 = vsel %vm745_vm15, %v1632_v32, -inf  ;;  %v1635_v59 = vmul.f32 0.2, %v1632_v32  ;;  %vm1634_vm12 = vcmp.gt.f32.partialorder %v1632_v32, 0.0  ;;  %vm1705_vm15 = vcmask 261120  }
0x29d9   :  { %1638 = vmax.xlane.f32.xlu0 %v1637_v33 }
0x29da   :  { %v2807_v46 = vsel %vm1634_vm12, %v1632_v32, %v1635_v59 }
0x29ed   :  { %1693 = vrot.lane.b32.xlu0 %v2749_v38, %s2096_s8 }
0x29f5   :  { %1764 = vrot.lane.b32.xlu0 %v2621_v56, %s2093_s15 }
0x29fd   :  { %1739 = vrot.lane.b32.xlu0 %v1506_v55, %s2097_s10 }
0x2a05   :  { %1743 = vrot.lane.b32.xlu0 %v2807_v46, %s2096_s8 }
0x2a4c   :  { %v1639_v34 = vpop.xlane.xlu0 %1638 }
0x2a4d   :  { %v1640_v16 = vsub.f32 %v1632_v32, %v1639_v34 }
0x2a4f   :  { %v1641_v39 = vmul.f32 1.442695, %v1640_v16 }
0x2a51   :  { %1997 = vpow2.f32 %v1641_v39 }
0x2a57   :  { %v1998_v40 = vpop.eup %1997 }
0x2a58   :  { %1644 = vrot.lane.b32.xlu1 %v1998_v40, %s2095_s0 }
0x2a60   :  { %1681 = vrot.lane.b32.xlu1 %v2540_v57, %s2098_s29 }
0x2a68   :  { %1684 = vrot.lane.b32.xlu1 %v2583_v7, %s2099_s1 }
0x2a70   :  { %1687 = vrot.lane.b32.xlu1 %v2629_v5, %s2100_s30 }
0x2aca   :  { %v1645_v56 = vpop.permute.xlu1 %1644 }
0x2acb   :  { %v1647_v38 = vsel %vm756_vm5, %v1645_v56, 0.0 }
0x2acc   :  { %1648 = vadd.xlane.f32.xlu2 %v1647_v38 }
0x2ad2   :  { %v1682_v57 = vpop.permute.xlu1 %1681 }
0x2ada   :  { %v1685_v5 = vpop.permute.xlu1 %1684 }
0x2ae2   :  { %v1688_v42 = vpop.permute.xlu1 %1687 }
0x2ae4   :  { %1678 = vrot.lane.b32.xlu2 %v2484_v29, %s2093_s15 }
0x2aec   :  { %1690 = vrot.lane.b32.xlu2 %v2679_v36, %s2097_s10 }
0x2af4   :  { %1723 = vrot.lane.b32.xlu2 %v2580_v43, %s2093_s15  ;;  %s2102_s15 = smov 72  }
0x2afc   :  { %1727 = vrot.lane.b32.xlu2 %v2626_v2, %s2098_s29 }
0x2b04   :  { %1731 = vrot.lane.b32.xlu2 %v2676_v19, %s2099_s1 }
0x2b0c   :  { %1768 = vrot.lane.b32.xlu2 %v2666_v58, %s2098_s29 }
0x2b14   :  { %1696 = vrot.lane.b32.xlu2 %v1547_v6, %s2101_s2 }
0x2b3f   :  { %v1649_v7 = vpop.xlane.xlu2 %1648 }
0x2b40   :  { %1999 = vrcp.f32 %v1649_v7  ;;  %v1661_v2 = vand.u32 2147483648, %v1649_v7  ;;  %v1659_v19 = vand.u32 2147483647, %v1649_v7  ;;  %vm1655_vm14 = vweird.f32 %v1649_v7 }
0x2b42   :  { %v1662_v44 = vor.u32 1.1754944e-38, %v1661_v2  ;;  %vm1660_vm3 = vcmp.eq.f32.partialorder %v1659_v19, 8.507059e+37 }
0x2b46   :  { %v2000_v29 = vpop.eup %1999 }
0x2b47   :  { %v1651_v41 = vmul.f32 %v2000_v29, %v1649_v7  ;;  %v1679_v20 = vpop.permute.xlu2 %1678  ;;  %vm1656_vm5 = vweird.f32 %v2000_v29 }
0x2b48   :  { %v1703_v36 = vsel %vm663_vm6, 0.0, %v1679_v20  ;;  %vm1657_vm2 = vmor %vm1655_vm14, %vm1656_vm5 }
0x2b49   :  { %v1652_v31 = vsub.f32 1.0, %v1651_v41  ;;  %v1704_v43 = vsel %vm665_vm7, %v1703_v36, %v1682_v57 }
0x2b4a   :  { %v1706_v58 = vsel %vm1705_vm15, %v1704_v43, %v1685_v5 }
0x2b4b   :  { %v1653_v49 = vmul.f32 %v2000_v29, %v1652_v31  ;;  %v1708_v48 = vsel %vm1707_vm13, %v1706_v58, %v1688_v42 }
0x2b4d   :  { %v1654_v35 = vadd.f32 %v2000_v29, %v1653_v49 }
0x2b4f   :  { %v1691_v45 = vpop.permute.xlu2 %1690  ;;  %v1658_v13 = vsel %vm1657_vm2, %v2000_v29, %v1654_v35 }
0x2b50   :  { %v2832_v15 = vsel %vm1709_vm1, %v1708_v48, %v1691_v45  ;;  %v1663_v24 = vsel %vm1660_vm3, %v1662_v44, %v1658_v13 }
0x2b51   :  { %v1664_v25 = vmul.f32 %v1998_v40, %v1663_v24 }
0x2b53   :  { %v1665_v28 = vmul.f32 0.5, %v1664_v25  ;;  %1780 = vrot.lane.b32.xlu0 %v1664_v25, %s2097_s10 }
0x2b55   :  { %v1666_v47 = vmul.f32 1.442695, %v1665_v28 }
0x2b57   :  { %2001 = vpow2.f32 %v1666_v47 }
0x2b5d   :  { %v2002_v50 = vpop.eup %2001 }
0x2b5e   :  { %v1669_v26 = vrot.slane %v2002_v50, 2 }
0x2b60   :  { %1670 = vrot.lane.b32.xlu1 %v1669_v26, %s2095_s0 }
0x2b68   :  { %1719 = vrot.lane.b32.xlu1 %v2537_v54, %s2092_s4  ;;  %v1694_v54 = vpop.permute.xlu0 %1693 }
0x2b69   :  { %v1712_v39 = vsel %vm1711_vm8, %v2832_v15, %v1694_v54 }
0x2b70   :  { %1756 = vrot.lane.b32.xlu1 %v2459_v0, %s2095_s0  ;;  %v1765_v18 = vpop.permute.xlu0 %1764 }
0x2b78   :  { %1760 = vrot.lane.b32.xlu1 %v2575_v3, %s2092_s4  ;;  %v1724_v3 = vpop.permute.xlu2 %1723  ;;  %v1740_v60 = vpop.permute.xlu0 %1739  ;;  %s2103_s4 = smov [#allocation4]  }
0x2b79   :  { %s1807_s0 = sshll.u32 %s2103_s4, 4  ;;  %s1808_s0 = int_to_ptr.vmem [resolvable:$true] %s1807_s0 }
0x2b80   :  { %1735 = vrot.lane.b32.xlu1 %v2746_v37, %s2100_s30  ;;  %v1728_v37 = vpop.permute.xlu2 %1727 }
0x2b88   :  { %1772 = vrot.lane.b32.xlu1 %v2741_v11, %s2099_s1  ;;  %v1732_v52 = vpop.permute.xlu2 %1731 }
0x2b90   :  { %1776 = vrot.lane.b32.xlu1 %v2783_v14, %s2100_s30  ;;  %v1769_v30 = vpop.permute.xlu2 %1768 }
0x2b98   :  { %v1697_v16 = vpop.permute.xlu2 %1696 }
0x2b99   :  { %v1713_v40 = vsel %vm692_vm9, %v1712_v39, %v1697_v16 }
0x2bd2   :  { %v1671_v62 = vpop.permute.xlu1 %1670 }
0x2bd3   :  { %v1673_v55 = vmul.f32 %v1671_v62, %v2673_v1 }
0x2bd5   :  { %v1675_v6 = vrot.slane %v1673_v55, 6 }
0x2bd7   :  { %v1677_v8 = vadd.f32 %v1675_v6, %v2807_v46 }
0x2bd9   :  { %1700 = vrot.lane.b32.xlu2 %v1677_v8, %s2102_s15 }
0x2bda   :  { %v1720_v0 = vpop.permute.xlu1 %1719 }
0x2bdb   :  { %v1746_v11 = vsel %vm82_vm0, %v2481_v17, %v1720_v0  ;;  %v1744_v17 = vpop.permute.xlu0 %1743 }
0x2bdc   :  { %v1747_v14 = vsel %vm663_vm6, %v1746_v11, %v1724_v3 }
0x2bdd   :  { %v1748_v1 = vsel %vm665_vm7, %v1747_v14, %v1728_v37 }
0x2bde   :  { %v1749_v23 = vsel %vm1705_vm15, %v1748_v1, %v1732_v52 }
0x2be2   :  { %v1757_v21 = vpop.permute.xlu1 %1756 }
0x2be3   :  { %v1783_v9 = vsel %vm82_vm0, %v1757_v21, %v2532_v27  ;;  %v1781_v46 = vpop.permute.xlu0 %1780  ;;  %vm1714_vm0 = vcmask 588800  }
0x2bea   :  { %v1761_v51 = vpop.permute.xlu1 %1760 }
0x2beb   :  { %v1784_v10 = vsel %vm663_vm6, %v1783_v9, %v1761_v51  ;;  %vm1716_vm6 = vcmask 648192  }
0x2bec   :  { %v1785_v53 = vsel %vm665_vm7, %v1784_v10, %v1765_v18 }
0x2bed   :  { %v1786_v32 = vsel %vm1705_vm15, %v1785_v53, %v1769_v30 }
0x2bf2   :  { %v1736_v12 = vpop.permute.xlu1 %1735 }
0x2bf3   :  { %v1750_v22 = vsel %vm1707_vm13, %v1749_v23, %v1736_v12 }
0x2bf4   :  { %v1751_v61 = vsel %vm1709_vm1, %v1750_v22, %v1740_v60 }
0x2bf5   :  { %v1752_v63 = vsel %vm1711_vm8, %v1751_v61, %v1744_v17 }
0x2bf6   :  { %1754 = vst.msk [vmem:[#allocation4] sm:$0x3] %vm1753_vm4, %v1752_v63 }
0x2bf7   :  { %1812 = dma.vmem_to_hbm [thread:$0]  %s1808_s0, 32, %s1810_s18, [#allocation5]  }
0x2bfa   :  { %v1773_v4 = vpop.permute.xlu1 %1772 }
0x2bfb   :  { %v1787_v33 = vsel %vm1707_vm13, %v1786_v32, %v1773_v4 }
0x2c02   :  { %v1777_v59 = vpop.permute.xlu1 %1776 }
0x2c03   :  { %v1788_v27 = vsel %vm1709_vm1, %v1787_v33, %v1777_v59 }
0x2c04   :  { %v1789_v34 = vsel %vm1711_vm8, %v1788_v27, %v1781_v46 }
0x2c05   :  { %1790 = vst.msk [vmem:[#allocation6] sm:$0x3] %vm1753_vm4, %v1789_v34 }
0x2c06   :  { %1823 = dma.vmem_to_hbm [thread:$0]  %s1819_s19, 32, %s1821_s22, [#allocation5]  }
0x2c33   :  { %v1701_v56 = vpop.permute.xlu2 %1700 }
0x2c34   :  { %v1715_v38 = vsel %vm1714_vm0, %v1713_v40, %v1701_v56 }
0x2c35   :  { %1717 = vst.msk [vmem:[#allocation2] sm:$0x3] %vm1716_vm6, %v1715_v38 }
0x2c36   :  { %1801 = dma.vmem_to_hbm [thread:$0]  %s1797_s24, 32, %s1799_s25, [#allocation3]  }
0x2c37   :  { %2086 = dma.done.wait [#allocation3], 32  }
0x2c38   :  { %2087 = vsyncadd [#allocation3], 4294967264 }
0x2c39   :  { %2088 = dma.done.wait [#allocation5], 64  }
0x2c3a   :  { %2089 = vsyncadd [#allocation5], 4294967232 }
0x2c3b   :  { %1836 = vsyncpa [#allocation3], 1 }
0x2c3c   :  { %1837 = vsyncpa [#allocation5], 1 }

</bundles_post_ra>
